<compile_context>
chip_gen: v6e
topology: v6e:2x2x1
jax: 0.10.0
libtpu: 0.0.40
codegen_flags: <defaults>
</compile_context>

<pallas_src>
import jax
import jax.numpy as jnp
from jax.experimental import pallas as pl
from jax.experimental.pallas import tpu as pltpu

BOARD = 8                  # board_size
C_IN = 4                   # in_channels
C_HID = 8                  # hidden_channels
N_BLOCKS = 5               # conv -> BN -> ReLU blocks in self.f
NPOS = BOARD * BOARD       # 64 board positions
K_IN = C_IN * NPOS         # 256  flattened input features, (c, h, w) order
K_HID = C_HID * NPOS       # 512  flattened hidden features, (c, h, w) order
HEAD_W = 128               # fused head width: policy(64) + value(1), padded to 128 lanes
MAX_B_TILE = 256           # default max batch rows per grid step
BN_EPS = 1e-5


def _qnet_kernel(x_ref, w0_ref, wh_ref, shift_ref, whead_ref, bhead_ref, out_ref):
    """Full forward pass for one batch tile.

    x_ref:     (bt, 256)      NCHW-flattened input, bf16
    w0_ref:    (256, 512)     dense conv-0 matrix, BN scale pre-folded, bf16
    wh_ref:    (4, 512, 512)  dense conv-1..4 matrices, BN scale pre-folded, bf16
    shift_ref: (5, 512)       folded conv-bias + BN shift per output column, f32
    whead_ref: (512, 128)     fused head: cols 0..63 Conv_Policy, col 64 FC_Value, rest 0, bf16
    bhead_ref: (1, 128)       fused head bias row (Conv_Policy bias in lanes 0..63), f32
    out_ref:   (bt, 128)      lanes 0..63 softmax policy, lane 64 tanh value, rest 0, f32
    """
    f32 = jnp.float32
    bf16 = jnp.bfloat16

    shift = shift_ref[...]                                # (5, 512), loaded once

    # ---- trunk: 5 x (conv-as-GEMM, BN scale already in weights -> shift-add -> ReLU)
    acc = jnp.dot(x_ref[...], w0_ref[...], preferred_element_type=f32)   # (bt, 512)
    feat = jnp.maximum(acc + shift[0:1, :], 0.0)
    for l in range(N_BLOCKS - 1):                         # statically unrolled
        acc = jnp.dot(feat.astype(bf16), wh_ref[l], preferred_element_type=f32)
        feat = jnp.maximum(acc + shift[l + 1:l + 2, :], 0.0)

    # ---- fused policy + value head: one lane-dense (512, 128) GEMM --------
    head = jnp.dot(feat.astype(bf16), whead_ref[...],
                   preferred_element_type=f32) + bhead_ref[...]          # (bt, 128)

    lane = jax.lax.broadcasted_iota(jnp.int32, head.shape, 1)
    is_pol = lane < NPOS                                   # lanes 0..63: policy logits
    m = jnp.max(jnp.where(is_pol, head, jnp.float32(-1e30)),
                axis=-1, keepdims=True)                    # one lane reduce (XLU)
    e = jnp.where(is_pol, jnp.exp(head - m), 0.0)
    s = jnp.sum(e, axis=-1, keepdims=True)
    # approx reciprocal goes to the EUP slot; row-sum error ~1e-3.  Use an
    # exact divide instead if downstream sampling needs sum(probs) == 1.
    probs = e * pl.reciprocal(s, approx=True)
    value = jnp.where(lane == NPOS, jnp.tanh(head), 0.0)   # lane 64: tanh(value)
    out_ref[...] = probs + value                           # single lane-dense store


def _round_up(a, m):
    return ((a + m - 1) // m) * m


def _choose_batch_tile(batch, max_tile):
    """Rows per grid step: multiple of 8, <= max_tile, and at least 2 tiles
    whenever the batch allows it so v7x's second TensorCore is fed."""
    bt = min(max_tile, _round_up(batch, 8))
    n_tiles = pl.cdiv(batch, bt)
    if n_tiles == 1 and batch > 8:
        n_tiles = 2
    bt = _round_up(pl.cdiv(batch, n_tiles), 8)
    return bt, pl.cdiv(batch, bt)


def othello_qnet_forward(x, params, *, max_b_tile=MAX_B_TILE):
    """x: (..., C_IN, BOARD, BOARD) NCHW, like the PyTorch module.
    Returns (value, ac_probs) with shapes (B, 1) and (B, 64)."""
    # NCHW reshape(-1, C*H*W) is exactly the channel-major flatten the dense
    # conv matrices act on.  Board planes are exactly representable in bf16,
    # so the input cast is lossless for real Othello observations.
    x_flat = x.reshape(-1, K_IN).astype(jnp.bfloat16)
    B = x_flat.shape[0]
    b_tile, n_tiles = _choose_batch_tile(B, max_b_tile)
    b_pad = n_tiles * b_tile
    if b_pad != B:
        x_flat = jnp.pad(x_flat, ((0, b_pad - B), (0, 0)))

    grid_spec = pltpu.PrefetchScalarGridSpec(
        num_scalar_prefetch=0,
        grid=(n_tiles,),
        in_specs=[
            pl.BlockSpec((b_tile, K_IN), lambda b: (b, 0)),                   # x
            pl.BlockSpec((K_IN, K_HID), lambda b: (0, 0)),                    # w0
            pl.BlockSpec((N_BLOCKS - 1, K_HID, K_HID), lambda b: (0, 0, 0)),  # wh
            pl.BlockSpec((N_BLOCKS, K_HID), lambda b: (0, 0)),                # shift
            pl.BlockSpec((K_HID, HEAD_W), lambda b: (0, 0)),                  # whead
            pl.BlockSpec((1, HEAD_W), lambda b: (0, 0)),                      # bhead
        ],
        out_specs=pl.BlockSpec((b_tile, HEAD_W), lambda b: (b, 0)),
    )

    out = pl.pallas_call(
        _qnet_kernel,
        out_shape=jax.ShapeDtypeStruct((b_pad, HEAD_W), jnp.float32),
        grid_spec=grid_spec,
        compiler_params=pltpu.CompilerParams(
            dimension_semantics=("parallel",)),   # v7x: tiles split over 2 TCs
    )(x_flat, params["w0"], params["wh"], params["shift"],
      params["whead"], params["bhead"])

    value = out[:B, NPOS:NPOS + 1]
    ac_probs = out[:B, :NPOS]
    return value, ac_probs


# ---------------------------------------------------------------------------
# Parameter construction / packing (host-side, done once — like BN folding).
# ---------------------------------------------------------------------------
def _conv3x3_to_dense(w):
    """Lower a 3x3 / stride-1 / pad-1 conv on the fixed BOARD x BOARD board to
    a dense (C_in*64, C_out*64) matrix so that, on channel-major (c, h, w)
    flattened maps, `out_flat = in_flat @ M` (bias handled separately)."""
    c_out, c_in = w.shape[0], w.shape[1]
    n = NPOS
    hh, ww = jnp.meshgrid(jnp.arange(BOARD), jnp.arange(BOARD), indexing="ij")
    p_idx = jnp.arange(n)
    m = jnp.zeros((c_in, n, c_out, n), jnp.float32)
    for dy in range(3):
        for dx in range(3):
            hs, ws = hh + dy - 1, ww + dx - 1
            valid = ((hs >= 0) & (hs < BOARD) &
                     (ws >= 0) & (ws < BOARD)).reshape(-1)
            q = (jnp.clip(hs, 0, BOARD - 1) * BOARD
                 + jnp.clip(ws, 0, BOARD - 1)).reshape(-1)
            sel = jnp.zeros((n, n), jnp.float32).at[q, p_idx].add(
                valid.astype(jnp.float32))
            m = m + jnp.einsum("oc,qp->cqop", w[:, :, dy, dx], sel)
    return m.reshape(c_in * n, c_out * n)


def init_torch_params(key):
    """Deterministic synthetic parameters in the PyTorch module's own layout."""
    ks = iter(jax.random.split(key, 40))
    nk = lambda: next(ks)
    tp = {}
    cin = C_IN
    for i in range(N_BLOCKS):
        tp[f"conv{i}_w"] = 0.1 * jax.random.normal(nk(), (C_HID, cin, 3, 3), jnp.float32)
        tp[f"conv{i}_b"] = 0.05 * jax.random.normal(nk(), (C_HID,), jnp.float32)
        tp[f"bn{i}_gamma"] = 1.0 + 0.1 * jax.random.normal(nk(), (C_HID,), jnp.float32)
        tp[f"bn{i}_beta"] = 0.1 * jax.random.normal(nk(), (C_HID,), jnp.float32)
        tp[f"bn{i}_mean"] = 0.05 * jax.random.normal(nk(), (C_HID,), jnp.float32)
        tp[f"bn{i}_var"] = 1.0 + 0.1 * jnp.abs(jax.random.normal(nk(), (C_HID,), jnp.float32))
        cin = C_HID
    tp["policy_w"] = 0.1 * jax.random.normal(nk(), (1, C_HID, 3, 3), jnp.float32)
    tp["policy_b"] = 0.05 * jax.random.normal(nk(), (1,), jnp.float32)
    tp["fc_w"] = 0.02 * jax.random.normal(nk(), (1, K_HID), jnp.float32)
    return tp


def pack_params(tp):
    """PyTorch-layout params -> kernel layout (dense conv GEMMs with the BN
    scale folded into the weight columns, fused lane-dense policy+value head)."""
    dense, shifts = [], []
    for i in range(N_BLOCKS):
        scale = tp[f"bn{i}_gamma"] / jnp.sqrt(tp[f"bn{i}_var"] + BN_EPS)
        shift = scale * (tp[f"conv{i}_b"] - tp[f"bn{i}_mean"]) + tp[f"bn{i}_beta"]
        # Column order of the dense matrices is (c_out, h, w).
        col_scale = jnp.repeat(scale, NPOS)                          # (512,)
        dense.append((_conv3x3_to_dense(tp[f"conv{i}_w"])
                      * col_scale[None, :]).astype(jnp.bfloat16))
        shifts.append(jnp.repeat(shift, NPOS))

    # Fused head: columns 0..63 = Conv_Policy dense matrix, column 64 = FC_Value
    # weight (PyTorch FC_Value acts on the NCHW (c,h,w) flatten = our column
    # order, so no permutation), columns 65..127 = 0.
    wp = _conv3x3_to_dense(tp["policy_w"])                           # (512, 64)
    wv = tp["fc_w"].reshape(K_HID)                                   # (512,)
    whead = jnp.zeros((K_HID, HEAD_W), jnp.float32)
    whead = whead.at[:, :NPOS].set(wp).at[:, NPOS].set(wv)
    bhead = jnp.zeros((1, HEAD_W), jnp.float32).at[0, :NPOS].set(tp["policy_b"][0])

    return dict(
        w0=dense[0],                                                 # (256, 512) bf16
        wh=jnp.stack(dense[1:]),                                     # (4, 512, 512) bf16
        shift=jnp.stack(shifts).astype(jnp.float32),                 # (5, 512) f32
        whead=whead.astype(jnp.bfloat16),                            # (512, 128) bf16
        bhead=bhead,                                                 # (1, 128) f32
    )


def reference_forward(x, tp):
    """Pure-JAX f32 reference of the PyTorch forward (eval-mode BatchNorm)."""
    dn = ("NCHW", "OIHW", "NCHW")
    h = x.reshape(-1, C_IN, BOARD, BOARD).astype(jnp.float32)
    for i in range(N_BLOCKS):
        h = jax.lax.conv_general_dilated(h, tp[f"conv{i}_w"], (1, 1),
                                         ((1, 1), (1, 1)), dimension_numbers=dn)
        h = h + tp[f"conv{i}_b"][None, :, None, None]
        scale = tp[f"bn{i}_gamma"] / jnp.sqrt(tp[f"bn{i}_var"] + BN_EPS)
        h = ((h - tp[f"bn{i}_mean"][None, :, None, None])
             * scale[None, :, None, None] + tp[f"bn{i}_beta"][None, :, None, None])
        h = jnp.maximum(h, 0.0)
    logits = jax.lax.conv_general_dilated(h, tp["policy_w"], (1, 1),
                                          ((1, 1), (1, 1)), dimension_numbers=dn)
    logits = (logits + tp["policy_b"][None, :, None, None]).reshape(-1, NPOS)
    probs = jax.nn.softmax(logits, axis=1)
    value = jnp.tanh(h.reshape(-1, K_HID) @ tp["fc_w"].T)
    return value, probs


if __name__ == "__main__":
    key = jax.random.PRNGKey(0)
    pkey, xkey = jax.random.split(key)
    torch_params = init_torch_params(pkey)
    params = pack_params(torch_params)

    fwd = jax.jit(othello_qnet_forward)

    # --- small-batch test: batch=2, NCHW input exactly like the PyTorch module
    x = jax.random.normal(xkey, (2, C_IN, BOARD, BOARD), jnp.float32)
    value, ac_probs = fwd(x, params)
    jax.block_until_ready((value, ac_probs))

    assert value.shape == (2, 1)
    assert ac_probs.shape == (2, NPOS)
    assert bool(jnp.all(jnp.abs(jnp.sum(ac_probs, axis=1) - 1.0) < 5e-3))
    assert bool(jnp.all(jnp.abs(value) <= 1.0))

    v_ref, p_ref = reference_forward(x, torch_params)
    assert bool(jnp.max(jnp.abs(value - v_ref)) < 5e-2)
    assert bool(jnp.max(jnp.abs(ac_probs - p_ref)) < 1e-2)

    # --- multi-tile / padded-batch path (exercises grid > 1 and batch padding)
    x2 = jax.random.normal(jax.random.PRNGKey(1), (50, C_IN, BOARD, BOARD),
                           jnp.float32)
    v2, p2 = fwd(x2, params)
    jax.block_until_ready((v2, p2))
    assert v2.shape == (50, 1) and p2.shape == (50, NPOS)
    v2_ref, p2_ref = reference_forward(x2, torch_params)
    assert bool(jnp.max(jnp.abs(v2 - v2_ref)) < 5e-2)
    assert bool(jnp.max(jnp.abs(p2 - p2_ref)) < 1e-2)

    print("KERNEL_OK")
</pallas_src>

<mosaic_0001>
module attributes {stable_mosaic.version = 11 : i64} {
  func.func @_qnet_kernel(%arg0: i32, %arg1: memref<8x256xbf16, #tpu.memory_space<vmem>>, %arg2: memref<256x512xbf16, #tpu.memory_space<vmem>>, %arg3: memref<4x512x512xbf16, #tpu.memory_space<vmem>>, %arg4: memref<5x512xf32, #tpu.memory_space<vmem>>, %arg5: memref<512x128xbf16, #tpu.memory_space<vmem>>, %arg6: memref<1x128xf32, #tpu.memory_space<vmem>>, %arg7: memref<8x128xf32, #tpu.memory_space<vmem>>) attributes {dimension_semantics = [#tpu.dimension_semantics<parallel>], iteration_bounds = array<i64: 1>, scalar_prefetch = 0 : i64, scratch_operands = 0 : i64, tpu.core_type = #tpu.core_type<tc>, window_params = [{transform_indices = @transform_0, window_bounds = array<i64: 8, 256>}, {pipeline_mode = #tpu.pipeline_mode<synchronous>, transform_indices = @transform_1, window_bounds = array<i64: 256, 512>}, {pipeline_mode = #tpu.pipeline_mode<synchronous>, transform_indices = @transform_2, window_bounds = array<i64: 4, 512, 512>}, {pipeline_mode = #tpu.pipeline_mode<synchronous>, transform_indices = @transform_3, window_bounds = array<i64: 5, 512>}, {pipeline_mode = #tpu.pipeline_mode<synchronous>, transform_indices = @transform_4, window_bounds = array<i64: 512, 128>}, {pipeline_mode = #tpu.pipeline_mode<synchronous>, transform_indices = @transform_5, window_bounds = array<i64: 1, 128>}, {transform_indices = @transform_6, window_bounds = array<i64: 8, 128>}]} {
    %c0 = arith.constant 0 : index
    %c0_0 = arith.constant 0 : index
    %0 = vector.load %arg4[%c0, %c0_0] : memref<5x512xf32, #tpu.memory_space<vmem>>, vector<5x512xf32>
    %c0_1 = arith.constant 0 : index
    %c0_2 = arith.constant 0 : index
    %1 = vector.load %arg1[%c0_1, %c0_2] : memref<8x256xbf16, #tpu.memory_space<vmem>>, vector<8x256xbf16>
    %c0_3 = arith.constant 0 : index
    %c0_4 = arith.constant 0 : index
    %2 = vector.load %arg2[%c0_3, %c0_4] : memref<256x512xbf16, #tpu.memory_space<vmem>>, vector<256x512xbf16>
    %cst = arith.constant dense<0.000000e+00> : vector<8x512xf32>
    %3 = tpu.matmul %1, %2, %cst {dimension_numbers = #tpu.dot_dimension_numbers<[1], [0], [0], [1], [0, 0, 1, 1], [], []>} : vector<8x256xbf16>, vector<256x512xbf16>, vector<8x512xf32> -> vector<8x512xf32>
    %4 = vector.extract_strided_slice %0 {offsets = [0, 0], sizes = [1, 512], strides = [1, 1]} : vector<5x512xf32> to vector<1x512xf32>
    %5 = vector.broadcast %4 : vector<1x512xf32> to vector<8x512xf32>
    %6 = arith.addf %3, %5 : vector<8x512xf32>
    %cst_5 = arith.constant 0.000000e+00 : f32
    %7 = vector.broadcast %cst_5 : f32 to vector<8x512xf32>
    %8 = arith.maximumf %6, %7 : vector<8x512xf32>
    %9 = arith.truncf %8 : vector<8x512xf32> to vector<8x512xbf16>
    %c0_6 = arith.constant 0 : index
    %c0_7 = arith.constant 0 : index
    %c0_8 = arith.constant 0 : index
    %10 = vector.load %arg3[%c0_6, %c0_7, %c0_8] : memref<4x512x512xbf16, #tpu.memory_space<vmem>>, vector<1x512x512xbf16>
    %11 = vector.shape_cast %10 : vector<1x512x512xbf16> to vector<512x512xbf16>
    %cst_9 = arith.constant dense<0.000000e+00> : vector<8x512xf32>
    %12 = tpu.matmul %9, %11, %cst_9 {dimension_numbers = #tpu.dot_dimension_numbers<[1], [0], [0], [1], [0, 0, 1, 1], [], []>} : vector<8x512xbf16>, vector<512x512xbf16>, vector<8x512xf32> -> vector<8x512xf32>
    %13 = vector.extract_strided_slice %0 {offsets = [1, 0], sizes = [1, 512], strides = [1, 1]} : vector<5x512xf32> to vector<1x512xf32>
    %14 = vector.broadcast %13 : vector<1x512xf32> to vector<8x512xf32>
    %15 = arith.addf %12, %14 : vector<8x512xf32>
    %cst_10 = arith.constant 0.000000e+00 : f32
    %16 = vector.broadcast %cst_10 : f32 to vector<8x512xf32>
    %17 = arith.maximumf %15, %16 : vector<8x512xf32>
    %18 = arith.truncf %17 : vector<8x512xf32> to vector<8x512xbf16>
    %c1 = arith.constant 1 : index
    %c0_11 = arith.constant 0 : index
    %c0_12 = arith.constant 0 : index
    %19 = vector.load %arg3[%c1, %c0_11, %c0_12] : memref<4x512x512xbf16, #tpu.memory_space<vmem>>, vector<1x512x512xbf16>
    %20 = vector.shape_cast %19 : vector<1x512x512xbf16> to vector<512x512xbf16>
    %cst_13 = arith.constant dense<0.000000e+00> : vector<8x512xf32>
    %21 = tpu.matmul %18, %20, %cst_13 {dimension_numbers = #tpu.dot_dimension_numbers<[1], [0], [0], [1], [0, 0, 1, 1], [], []>} : vector<8x512xbf16>, vector<512x512xbf16>, vector<8x512xf32> -> vector<8x512xf32>
    %22 = vector.extract_strided_slice %0 {offsets = [2, 0], sizes = [1, 512], strides = [1, 1]} : vector<5x512xf32> to vector<1x512xf32>
    %23 = vector.broadcast %22 : vector<1x512xf32> to vector<8x512xf32>
    %24 = arith.addf %21, %23 : vector<8x512xf32>
    %cst_14 = arith.constant 0.000000e+00 : f32
    %25 = vector.broadcast %cst_14 : f32 to vector<8x512xf32>
    %26 = arith.maximumf %24, %25 : vector<8x512xf32>
    %27 = arith.truncf %26 : vector<8x512xf32> to vector<8x512xbf16>
    %c2 = arith.constant 2 : index
    %c0_15 = arith.constant 0 : index
    %c0_16 = arith.constant 0 : index
    %28 = vector.load %arg3[%c2, %c0_15, %c0_16] : memref<4x512x512xbf16, #tpu.memory_space<vmem>>, vector<1x512x512xbf16>
    %29 = vector.shape_cast %28 : vector<1x512x512xbf16> to vector<512x512xbf16>
    %cst_17 = arith.constant dense<0.000000e+00> : vector<8x512xf32>
    %30 = tpu.matmul %27, %29, %cst_17 {dimension_numbers = #tpu.dot_dimension_numbers<[1], [0], [0], [1], [0, 0, 1, 1], [], []>} : vector<8x512xbf16>, vector<512x512xbf16>, vector<8x512xf32> -> vector<8x512xf32>
    %31 = vector.extract_strided_slice %0 {offsets = [3, 0], sizes = [1, 512], strides = [1, 1]} : vector<5x512xf32> to vector<1x512xf32>
    %32 = vector.broadcast %31 : vector<1x512xf32> to vector<8x512xf32>
    %33 = arith.addf %30, %32 : vector<8x512xf32>
    %cst_18 = arith.constant 0.000000e+00 : f32
    %34 = vector.broadcast %cst_18 : f32 to vector<8x512xf32>
    %35 = arith.maximumf %33, %34 : vector<8x512xf32>
    %36 = arith.truncf %35 : vector<8x512xf32> to vector<8x512xbf16>
    %c3 = arith.constant 3 : index
    %c0_19 = arith.constant 0 : index
    %c0_20 = arith.constant 0 : index
    %37 = vector.load %arg3[%c3, %c0_19, %c0_20] : memref<4x512x512xbf16, #tpu.memory_space<vmem>>, vector<1x512x512xbf16>
    %38 = vector.shape_cast %37 : vector<1x512x512xbf16> to vector<512x512xbf16>
    %cst_21 = arith.constant dense<0.000000e+00> : vector<8x512xf32>
    %39 = tpu.matmul %36, %38, %cst_21 {dimension_numbers = #tpu.dot_dimension_numbers<[1], [0], [0], [1], [0, 0, 1, 1], [], []>} : vector<8x512xbf16>, vector<512x512xbf16>, vector<8x512xf32> -> vector<8x512xf32>
    %40 = vector.extract_strided_slice %0 {offsets = [4, 0], sizes = [1, 512], strides = [1, 1]} : vector<5x512xf32> to vector<1x512xf32>
    %41 = vector.broadcast %40 : vector<1x512xf32> to vector<8x512xf32>
    %42 = arith.addf %39, %41 : vector<8x512xf32>
    %cst_22 = arith.constant 0.000000e+00 : f32
    %43 = vector.broadcast %cst_22 : f32 to vector<8x512xf32>
    %44 = arith.maximumf %42, %43 : vector<8x512xf32>
    %45 = arith.truncf %44 : vector<8x512xf32> to vector<8x512xbf16>
    %c0_23 = arith.constant 0 : index
    %c0_24 = arith.constant 0 : index
    %46 = vector.load %arg5[%c0_23, %c0_24] : memref<512x128xbf16, #tpu.memory_space<vmem>>, vector<512x128xbf16>
    %cst_25 = arith.constant dense<0.000000e+00> : vector<8x128xf32>
    %47 = tpu.matmul %45, %46, %cst_25 {dimension_numbers = #tpu.dot_dimension_numbers<[1], [0], [0], [1], [0, 0, 1, 1], [], []>} : vector<8x512xbf16>, vector<512x128xbf16>, vector<8x128xf32> -> vector<8x128xf32>
    %c0_26 = arith.constant 0 : index
    %c0_27 = arith.constant 0 : index
    %48 = vector.load %arg6[%c0_26, %c0_27] : memref<1x128xf32, #tpu.memory_space<vmem>>, vector<1x128xf32>
    %49 = vector.broadcast %48 : vector<1x128xf32> to vector<8x128xf32>
    %50 = arith.addf %47, %49 : vector<8x128xf32>
    %51 = tpu.iota {dimensions = array<i32: 1>} : vector<8x128xi32>
    %c64_i32 = arith.constant 64 : i32
    %52 = vector.broadcast %c64_i32 : i32 to vector<8x128xi32>
    %53 = arith.cmpi slt, %51, %52 : vector<8x128xi32>
    %cst_28 = arith.constant -1.000000e+30 : f32
    %54 = vector.broadcast %cst_28 : f32 to vector<8x128xf32>
    %55 = arith.select %53, %50, %54 : vector<8x128xi1>, vector<8x128xf32>
    %cst_29 = arith.constant dense<0xFF800000> : vector<8xf32>
    %56 = vector.multi_reduction <maximumf>, %55, %cst_29 [1] : vector<8x128xf32> to vector<8xf32>
    %57 = vector.shape_cast %56 : vector<8xf32> to vector<8x1xf32>
    %58 = vector.broadcast %57 : vector<8x1xf32> to vector<8x128xf32>
    %59 = arith.subf %50, %58 : vector<8x128xf32>
    %60 = math.exp %59 : vector<8x128xf32>
    %cst_30 = arith.constant 0.000000e+00 : f32
    %61 = vector.broadcast %cst_30 : f32 to vector<8x128xf32>
    %62 = arith.select %53, %60, %61 : vector<8x128xi1>, vector<8x128xf32>
    %cst_31 = arith.constant dense<0.000000e+00> : vector<8xf32>
    %63 = vector.multi_reduction <add>, %62, %cst_31 [1] : vector<8x128xf32> to vector<8xf32>
    %64 = vector.shape_cast %63 : vector<8xf32> to vector<8x1xf32>
    %65 = tpu.reciprocal %64 {approx = true} : vector<8x1xf32> -> vector<8x1xf32>
    %66 = vector.broadcast %65 : vector<8x1xf32> to vector<8x128xf32>
    %67 = arith.mulf %62, %66 : vector<8x128xf32>
    %c64_i32_32 = arith.constant 64 : i32
    %68 = vector.broadcast %c64_i32_32 : i32 to vector<8x128xi32>
    %69 = arith.cmpi eq, %51, %68 : vector<8x128xi32>
    %70 = math.tanh %50 : vector<8x128xf32>
    %cst_33 = arith.constant 0.000000e+00 : f32
    %71 = vector.broadcast %cst_33 : f32 to vector<8x128xf32>
    %72 = arith.select %69, %70, %71 : vector<8x128xi1>, vector<8x128xf32>
    %73 = arith.addf %67, %72 : vector<8x128xf32>
    %c0_34 = arith.constant 0 : index
    %c0_35 = arith.constant 0 : index
    %74 = vector.load %arg7[%c0_34, %c0_35] : memref<8x128xf32, #tpu.memory_space<vmem>>, vector<8x128xf32>
    tpu.vector_store %arg7[%c0_34, %c0_35], %73 {strides = array<i32>} : memref<8x128xf32, #tpu.memory_space<vmem>>, vector<8x128xf32>,
    return
  }
  func.func @transform_0(%arg0: i32) -> (i32, i32) {
    %c0_i32 = arith.constant 0 : i32
    %c0_i32_0 = arith.constant 0 : i32
    return %arg0, %c0_i32 : i32, i32
  }
  func.func @transform_1(%arg0: i32) -> (i32, i32) {
    %c0_i32 = arith.constant 0 : i32
    %c0_i32_0 = arith.constant 0 : i32
    %c0_i32_1 = arith.constant 0 : i32
    return %c0_i32, %c0_i32_0 : i32, i32
  }
  func.func @transform_2(%arg0: i32) -> (i32, i32, i32) {
    %c0_i32 = arith.constant 0 : i32
    %c0_i32_0 = arith.constant 0 : i32
    %c0_i32_1 = arith.constant 0 : i32
    %c0_i32_2 = arith.constant 0 : i32
    return %c0_i32, %c0_i32_0, %c0_i32_1 : i32, i32, i32
  }
  func.func @transform_3(%arg0: i32) -> (i32, i32) {
    %c0_i32 = arith.constant 0 : i32
    %c0_i32_0 = arith.constant 0 : i32
    %c0_i32_1 = arith.constant 0 : i32
    return %c0_i32, %c0_i32_0 : i32, i32
  }
  func.func @transform_4(%arg0: i32) -> (i32, i32) {
    %c0_i32 = arith.constant 0 : i32
    %c0_i32_0 = arith.constant 0 : i32
    %c0_i32_1 = arith.constant 0 : i32
    return %c0_i32, %c0_i32_0 : i32, i32
  }
  func.func @transform_5(%arg0: i32) -> (i32, i32) {
    %c0_i32 = arith.constant 0 : i32
    %c0_i32_0 = arith.constant 0 : i32
    %c0_i32_1 = arith.constant 0 : i32
    return %c0_i32, %c0_i32_0 : i32, i32
  }
  func.func @transform_6(%arg0: i32) -> (i32, i32) {
    %c0_i32 = arith.constant 0 : i32
    %c0_i32_0 = arith.constant 0 : i32
    return %arg0, %c0_i32 : i32, i32
  }
}

</mosaic_0001>

<bundles_post_ra>
// kernel: othello_qnet_forward.1
= control target key start
LH: loop header
LB: loop body
LE: loop exit
PB: predicated region body
PF: predicated region fallthrough
CT: control target
= control target key end

     0   :  { %11 = vsyncpa [#allocation3], 0  ;;  %s6636_s0 = inlined_call_operand.vmem [shape: bf16[8,256], index: 0, kind: input, shape index: {}]   ;;  %s6637_s1 = inlined_call_operand.hbm [shape: bf16[256,512], index: 1, kind: input, shape index: {}]   ;;  %s6638_s2 = inlined_call_operand.hbm [shape: bf16[4,512,512], index: 2, kind: input, shape index: {}]   ;;  %s6639_s3 = inlined_call_operand.hbm [shape: f32[5,512], index: 3, kind: input, shape index: {}]   ;;  %s6640_s4 = inlined_call_operand.hbm [shape: bf16[512,128], index: 4, kind: input, shape index: {}]   ;;  %s6641_s5 = inlined_call_operand.hbm [shape: f32[1,128], index: 5, kind: input, shape index: {}]   ;;  %s6642_s6 = inlined_call_operand.vmem [shape: f32[8,128], index: 6, kind: output, shape index: {}]  }
   0x1   :  { %12 = vsyncpa [#allocation5], 0 }
   0x2   :  { %13 = vsyncpa [#allocation8], 0  ;;  %s6466_s21 = smov [#allocation4]   ;;  %s6467_s23 = smov [#allocation7]  }
   0x3   :  { %s33_s22 = sshll.u32 %s6466_s21, 4  ;;  %s55_s24 = sshll.u32 %s6467_s23, 4  ;;  %s34_s22 = int_to_ptr.vmem [resolvable:$true] %s33_s22  ;;  %s56_s24 = int_to_ptr.vmem [resolvable:$true] %s55_s24 }
   0x4   :  { %s6368_s25 = scalar_lea.vmem %s34_s22, 65536  ;;  %p6373_p1 = scmp.lt.s32.totalorder %s34_s22, %s34_s22 }
   0x5   :  { %p6369_p0 = scmp.ne.s32.totalorder %s34_s22, %s6368_s25  ;;  %p6374_p2 = scmp.lt.s32.totalorder %s6368_s25, %s6368_s25 }
   0x7   :  { %p6375_p3 = por %p6374_p2, %p6373_p1 }
   0x9   :  { %p6376_p4 = pnand %p6375_p3, %p6369_p0 }
   0xb   :  { %6379 = shalt.err (!%p6376_p4)
}
   0xc   :  { %s6468_s26 = smov 256   ;;  %s6469_s27 = smov 16  }
   0xd   :  { %39 = dma.hbm_to_vmem [thread:$0]  %s6638_s2, 65536, %s34_s22, [#allocation5], %s6468_s26, %s6468_s26, %s6469_s27  }
   0xe   :  { %s6388_s30 = scalar_lea.vmem %s56_s24, 4096  ;;  %p6393_p6 = scmp.lt.s32.totalorder %s56_s24, %s56_s24 }
   0xf   :  { %p6389_p5 = scmp.ne.s32.totalorder %s56_s24, %s6388_s30  ;;  %p6394_p7 = scmp.lt.s32.totalorder %s6388_s30, %s6388_s30 }
  0x11   :  { %p6395_p8 = por %p6394_p7, %p6393_p6 }
  0x13   :  { %p6396_p9 = pnand %p6395_p8, %p6389_p5 }
  0x15   :  { %6399 = shalt.err (!%p6396_p9)
}
  0x16   :  { %s6470_s7 = smov 64   ;;  %s6471_s8 = smov 4  }
  0x17   :  { %61 = dma.hbm_to_vmem [thread:$0]  %s6640_s4, 4096, %s56_s24, [#allocation8], %s6470_s7, %s6470_s7, %s6471_s8  }
  0x18   :  { %s6472_s11 = smov [#allocation2]   ;;  %s6473_s13 = smov [#allocation6]  }
  0x19   :  { %s21_s12 = sshll.u32 %s6472_s11, 4  ;;  %s46_s14 = sshll.u32 %s6473_s13, 4  ;;  %s22_s12 = int_to_ptr.vmem [resolvable:$true] %s21_s12  ;;  %s47_s14 = int_to_ptr.vmem [resolvable:$true] %s46_s14 }
  0x1a   :  { %s6408_s2 = scalar_lea.vmem %s22_s12, 8192  ;;  %p6413_p11 = scmp.lt.s32.totalorder %s22_s12, %s22_s12 }
  0x1b   :  { %p6409_p10 = scmp.ne.s32.totalorder %s22_s12, %s6408_s2  ;;  %p6414_p12 = scmp.lt.s32.totalorder %s6408_s2, %s6408_s2 }
  0x1d   :  { %p6415_p13 = por %p6414_p12, %p6413_p11 }
  0x1f   :  { %p6416_p0 = pnand %p6415_p13, %p6409_p10 }
  0x21   :  { %6419 = shalt.err (!%p6416_p0)
}
  0x22   :  { %27 = dma.hbm_to_vmem [thread:$0]  %s6637_s1, 8192, %s22_s12, [#allocation3], %s6468_s26, %s6468_s26, %s6469_s27  }
  0x23   :  { %s6428_s17 = scalar_lea.vmem %s47_s14, 512  ;;  %p6433_p2 = scmp.lt.s32.totalorder %s47_s14, %s47_s14 }
  0x24   :  { %p6429_p1 = scmp.ne.s32.totalorder %s47_s14, %s6428_s17  ;;  %p6434_p3 = scmp.lt.s32.totalorder %s6428_s17, %s6428_s17 }
  0x26   :  { %p6435_p4 = por %p6434_p3, %p6433_p2 }
  0x28   :  { %p6436_p5 = pnand %p6435_p4, %p6429_p1 }
  0x2a   :  { %6439 = shalt.err (!%p6436_p5)
}
  0x2b   :  { %49 = dma.hbm_to_vmem [thread:$0]  %s6639_s3, 512, %s47_s14, [#allocation5]  }
  0x2c   :  { %s6474_s19 = smov [#allocation9]  }
  0x2d   :  { %s68_s20 = sshll.u32 %s6474_s19, 4  ;;  %s69_s20 = int_to_ptr.vmem [resolvable:$true] %s68_s20 }
  0x2e   :  { %s6448_s21 = scalar_lea.vmem %s69_s20, 16  ;;  %s6452_s22 = scalar_lea.vmem %s69_s20, 32 }
  0x2f   :  { %p6449_p6 = scmp.ne.s32.totalorder %s69_s20, %s6448_s21  ;;  %p6453_p7 = scmp.lt.s32.totalorder %s69_s20, %s69_s20 }
  0x30   :  { %p6454_p8 = scmp.lt.s32.totalorder %s6452_s22, %s6448_s21 }
  0x32   :  { %p6455_p9 = por %p6454_p8, %p6453_p7 }
  0x34   :  { %p6456_p10 = pnand %p6455_p9, %p6449_p6 }
  0x36   :  { %6459 = shalt.err (!%p6456_p10)
}
  0x37   :  { %71 = dma.hbm_to_vmem [thread:$0]  %s6641_s5, 16, %s69_s20, [#allocation8]  }
  0x38   :  { %6460 = dma.done.wait [#allocation3], 8192  }
  0x39   :  { %6461 = vsyncadd [#allocation3], 4294959104 }
  0x3a   :  { %6462 = dma.done.wait [#allocation5], 66048  }
  0x3b   :  { %6463 = vsyncadd [#allocation5], 4294901248 }
  0x3c   :  { %6464 = dma.done.wait [#allocation8], 4112  }
  0x3d   :  { %6465 = vsyncadd [#allocation8], 4294963184  ;;  %v5450_v0 = vld [vmem:[#allocation2 + $0xe4] ss:$16 sps:$4 sm:$0xff]   ;;  %v5452_v1 = vld [vmem:[#allocation2 + $0xec] ss:$16 sps:$4 sm:$0xff]  }
  0x3e   :  { %500 = vmatprep.subr.bf16.mxu0 %v5450_v0  ;;  %v5454_v2 = vld [vmem:[#allocation2 + $0xe0] ss:$16 sps:$4 sm:$0xff]   ;;  %v5455_v3 = vld [vmem:[#allocation2 + $0xe8] ss:$16 sps:$4 sm:$0xff]   ;;  %541 = vmatprep.subr.bf16.mxu1 %v5452_v1  ;;  %v5456_v4 = vld [vmem:[#allocation2 + $0xc4] ss:$16 sps:$4 sm:$0xff]  }
  0x3f   :  { %501 = vmatpush1.bf16.msra.mxu0 %v5454_v2  ;;  %542 = vmatpush1.bf16.msra.mxu1 %v5455_v3  ;;  %v5458_v5 = vld [vmem:[#allocation2 + $0xcc] ss:$16 sps:$4 sm:$0xff]   ;;  %v5460_v6 = vld [vmem:[#allocation2 + $0xc0] ss:$16 sps:$4 sm:$0xff]   ;;  %v5461_v7 = vld [vmem:[#allocation2 + $0xc8] ss:$16 sps:$4 sm:$0xff]  }
  0x40   :  { %502 = vmatprep.subr.bf16.mxu0 %v5456_v4  ;;  %543 = vmatprep.subr.bf16.mxu1 %v5458_v5  ;;  %v5462_v8 = vld [vmem:[#allocation2 + $0xa4] ss:$16 sps:$4 sm:$0xff]   ;;  %v5464_v9 = vld [vmem:[#allocation2 + $0xac] ss:$16 sps:$4 sm:$0xff]   ;;  %v5466_v10 = vld [vmem:[#allocation2 + $0xa0] ss:$16 sps:$4 sm:$0xff]  }
  0x41   :  { %v5467_v11 = vld [vmem:[#allocation2 + $0xa8] ss:$16 sps:$4 sm:$0xff]   ;;  %v5468_v12 = vld [vmem:[#allocation2 + $0x84] ss:$16 sps:$4 sm:$0xff]   ;;  %v5470_v13 = vld [vmem:[#allocation2 + $0x8c] ss:$16 sps:$4 sm:$0xff]  }
  0x42   :  { %v5472_v14 = vld [vmem:[#allocation2 + $0x80] ss:$16 sps:$4 sm:$0xff]   ;;  %v5473_v15 = vld [vmem:[#allocation2 + $0x88] ss:$16 sps:$4 sm:$0xff]   ;;  %v5474_v16 = vld [vmem:[#allocation2 + $0x64] ss:$16 sps:$4 sm:$0xff]  }
  0x43   :  { %503 = vmatpush1.bf16.msra.mxu0 %v5460_v6  ;;  %544 = vmatpush1.bf16.msra.mxu1 %v5461_v7  ;;  %v5476_v17 = vld [vmem:[#allocation2 + $0x6c] ss:$16 sps:$4 sm:$0xff]   ;;  %v5478_v18 = vld [vmem:[#allocation2 + $0x60] ss:$16 sps:$4 sm:$0xff]   ;;  %v5479_v19 = vld [vmem:[#allocation2 + $0x68] ss:$16 sps:$4 sm:$0xff]  }
  0x44   :  { %504 = vmatprep.subr.bf16.mxu0 %v5462_v8  ;;  %545 = vmatprep.subr.bf16.mxu1 %v5464_v9  ;;  %v5480_v20 = vld [vmem:[#allocation2 + $0x44] ss:$16 sps:$4 sm:$0xff]   ;;  %v5482_v21 = vld [vmem:[#allocation2 + $0x4c] ss:$16 sps:$4 sm:$0xff]   ;;  %v5484_v22 = vld [vmem:[#allocation2 + $0x40] ss:$16 sps:$4 sm:$0xff]  }
  0x45   :  { %v5485_v23 = vld [vmem:[#allocation2 + $0x48] ss:$16 sps:$4 sm:$0xff]   ;;  %v5486_v24 = vld [vmem:[#allocation2 + $0x24] ss:$16 sps:$4 sm:$0xff]   ;;  %v5488_v25 = vld [vmem:[#allocation2 + $0x2c] ss:$16 sps:$4 sm:$0xff]  }
  0x46   :  { %v5490_v26 = vld [vmem:[#allocation2 + $0x20] ss:$16 sps:$4 sm:$0xff]   ;;  %v5491_v27 = vld [vmem:[#allocation2 + $0x28] ss:$16 sps:$4 sm:$0xff]   ;;  %v5492_v28 = vld [vmem:[#allocation2 + $0x4] ss:$16 sps:$4 sm:$0xff]  }
  0x47   :  { %505 = vmatpush1.bf16.msra.mxu0 %v5466_v10  ;;  %546 = vmatpush1.bf16.msra.mxu1 %v5467_v11  ;;  %v5494_v29 = vld [vmem:[#allocation2 + $0xc] ss:$16 sps:$4 sm:$0xff]   ;;  %v5496_v30 = vld [vmem:[#allocation2] ss:$16 sps:$4 sm:$0xff]   ;;  %v5497_v31 = vld [vmem:[#allocation2 + $0x8] ss:$16 sps:$4 sm:$0xff]  }
  0x48   :  { %506 = vmatprep.subr.bf16.mxu0 %v5468_v12  ;;  %547 = vmatprep.subr.bf16.mxu1 %v5470_v13  ;;  %v5498_v32 = vld [vmem:[#allocation2 + $0x1e4] ss:$16 sps:$4 sm:$0xff]   ;;  %v5500_v33 = vld [vmem:[#allocation2 + $0x1ec] ss:$16 sps:$4 sm:$0xff]   ;;  %v5502_v34 = vld [vmem:[#allocation2 + $0x1e0] ss:$16 sps:$4 sm:$0xff]  }
  0x49   :  { %v5503_v35 = vld [vmem:[#allocation2 + $0x1e8] ss:$16 sps:$4 sm:$0xff]   ;;  %v5504_v36 = vld [vmem:[#allocation2 + $0x1c4] ss:$16 sps:$4 sm:$0xff]   ;;  %v5506_v37 = vld [vmem:[#allocation2 + $0x1cc] ss:$16 sps:$4 sm:$0xff]  }
  0x4a   :  { %v5508_v38 = vld [vmem:[#allocation2 + $0x1c0] ss:$16 sps:$4 sm:$0xff]   ;;  %v5509_v39 = vld [vmem:[#allocation2 + $0x1c8] ss:$16 sps:$4 sm:$0xff]   ;;  %v5510_v40 = vld [vmem:[#allocation2 + $0x1a4] ss:$16 sps:$4 sm:$0xff]  }
  0x4b   :  { %507 = vmatpush1.bf16.msra.mxu0 %v5472_v14  ;;  %548 = vmatpush1.bf16.msra.mxu1 %v5473_v15  ;;  %v5512_v41 = vld [vmem:[#allocation2 + $0x1ac] ss:$16 sps:$4 sm:$0xff]   ;;  %v5514_v42 = vld [vmem:[#allocation2 + $0x1a0] ss:$16 sps:$4 sm:$0xff]   ;;  %v5515_v43 = vld [vmem:[#allocation2 + $0x1a8] ss:$16 sps:$4 sm:$0xff]  }
  0x4c   :  { %508 = vmatprep.subr.bf16.mxu0 %v5474_v16  ;;  %549 = vmatprep.subr.bf16.mxu1 %v5476_v17  ;;  %v5516_v44 = vld [vmem:[#allocation2 + $0x184] ss:$16 sps:$4 sm:$0xff]   ;;  %v5518_v45 = vld [vmem:[#allocation2 + $0x18c] ss:$16 sps:$4 sm:$0xff]   ;;  %v5520_v47 = vld [vmem:[#allocation2 + $0x180] ss:$16 sps:$4 sm:$0xff]  }
  0x4d   :  { %v92_v46 = vld [vmem:[%s6636_s0] sm:$0xff]  ;;  %v5521_v49 = vld [vmem:[#allocation2 + $0x188] ss:$16 sps:$4 sm:$0xff]   ;;  %v5524_v51 = vld [vmem:[#allocation2 + $0x16c] ss:$16 sps:$4 sm:$0xff]  }
  0x4e   :  { %v4787_v48 = vcombine.high %v92_v46, %v92_v46  ;;  %v5522_v50 = vld [vmem:[#allocation2 + $0x164] ss:$16 sps:$4 sm:$0xff]   ;;  %v5526_v52 = vld [vmem:[#allocation2 + $0x160] ss:$16 sps:$4 sm:$0xff]   ;;  %v5527_v53 = vld [vmem:[#allocation2 + $0x168] ss:$16 sps:$4 sm:$0xff]   ;;  %v4786_v4 = vcombine.low %v92_v46, %v92_v46 }
  0x4f   :  { %509 = vmatpush1.bf16.msra.mxu0 %v5478_v18  ;;  %550 = vmatpush1.bf16.msra.mxu1 %v5479_v19  ;;  %v5528_v54 = vld [vmem:[#allocation2 + $0x144] ss:$16 sps:$4 sm:$0xff]   ;;  %v5530_v55 = vld [vmem:[#allocation2 + $0x14c] ss:$16 sps:$4 sm:$0xff]   ;;  %v5532_v56 = vld [vmem:[#allocation2 + $0x140] ss:$16 sps:$4 sm:$0xff]  }
  0x50   :  { %510 = vmatprep.subr.bf16.mxu0 %v5480_v20  ;;  %551 = vmatprep.subr.bf16.mxu1 %v5482_v21  ;;  %v5533_v57 = vld [vmem:[#allocation2 + $0x148] ss:$16 sps:$4 sm:$0xff]   ;;  %v5534_v58 = vld [vmem:[#allocation2 + $0x124] ss:$16 sps:$4 sm:$0xff]   ;;  %v5536_v59 = vld [vmem:[#allocation2 + $0x12c] ss:$16 sps:$4 sm:$0xff]  }
  0x51   :  { %532 = vmatprep.mubr.bf16.mxu0 %v4787_v48  ;;  %573 = vmatprep.mubr.bf16.mxu1 %v4787_v48  ;;  %v5538_v60 = vld [vmem:[#allocation2 + $0x120] ss:$16 sps:$4 sm:$0xff]   ;;  %v5539_v61 = vld [vmem:[#allocation2 + $0x128] ss:$16 sps:$4 sm:$0xff]   ;;  %v5540_v62 = vld [vmem:[#allocation2 + $0x104] ss:$16 sps:$4 sm:$0xff]  }
  0x52   :  { %v5542_v63 = vld [vmem:[#allocation2 + $0x10c] ss:$16 sps:$4 sm:$0xff]   ;;  %v5544_v0 = vld [vmem:[#allocation2 + $0x100] ss:$16 sps:$4 sm:$0xff]   ;;  %v5545_v1 = vld [vmem:[#allocation2 + $0x108] ss:$16 sps:$4 sm:$0xff]  }
  0x53   :  { %511 = vmatpush1.bf16.msra.mxu0 %v5484_v22  ;;  %552 = vmatpush1.bf16.msra.mxu1 %v5485_v23  ;;  %v5550_v2 = vld [vmem:[#allocation4 + $0xe4] ss:$16 sps:$4 sm:$0xff]   ;;  %v5548_v5 = vld [vmem:[#allocation4 + $0xe0] ss:$16 sps:$4 sm:$0xff]  }
  0x54   :  { %512 = vmatprep.subr.bf16.mxu0 %v5486_v24  ;;  %553 = vmatprep.subr.bf16.mxu1 %v5488_v25  ;;  %v5553_v3 = vld [vmem:[#allocation4 + $0x2e4] ss:$16 sps:$4 sm:$0xff]   ;;  %v5551_v6 = vld [vmem:[#allocation4 + $0x2e0] ss:$16 sps:$4 sm:$0xff]  }
  0x55   :  { %v5556_v7 = vld [vmem:[#allocation4 + $0xc4] ss:$16 sps:$4 sm:$0xff]   ;;  %v5554_v9 = vld [vmem:[#allocation4 + $0xc0] ss:$16 sps:$4 sm:$0xff]  }
  0x56   :  { %v5559_v8 = vld [vmem:[#allocation4 + $0x2c4] ss:$16 sps:$4 sm:$0xff]   ;;  %v5557_v10 = vld [vmem:[#allocation4 + $0x2c0] ss:$16 sps:$4 sm:$0xff]  }
  0x57   :  { %513 = vmatpush1.bf16.msra.mxu0 %v5490_v26  ;;  %554 = vmatpush1.bf16.msra.mxu1 %v5491_v27  ;;  %v5562_v11 = vld [vmem:[#allocation4 + $0xa4] ss:$16 sps:$4 sm:$0xff]   ;;  %v5560_v13 = vld [vmem:[#allocation4 + $0xa0] ss:$16 sps:$4 sm:$0xff]  }
  0x58   :  { %514 = vmatprep.subr.bf16.mxu0 %v5492_v28  ;;  %555 = vmatprep.subr.bf16.mxu1 %v5494_v29  ;;  %v5565_v12 = vld [vmem:[#allocation4 + $0x2a4] ss:$16 sps:$4 sm:$0xff]   ;;  %v5563_v14 = vld [vmem:[#allocation4 + $0x2a0] ss:$16 sps:$4 sm:$0xff]  }
  0x59   :  { %v5568_v15 = vld [vmem:[#allocation4 + $0x84] ss:$16 sps:$4 sm:$0xff]   ;;  %v5566_v17 = vld [vmem:[#allocation4 + $0x80] ss:$16 sps:$4 sm:$0xff]  }
  0x5a   :  { %v5571_v16 = vld [vmem:[#allocation4 + $0x284] ss:$16 sps:$4 sm:$0xff]   ;;  %v5569_v18 = vld [vmem:[#allocation4 + $0x280] ss:$16 sps:$4 sm:$0xff]  }
  0x5b   :  { %515 = vmatpush1.bf16.msra.mxu0 %v5496_v30  ;;  %556 = vmatpush1.bf16.msra.mxu1 %v5497_v31  ;;  %v5574_v19 = vld [vmem:[#allocation4 + $0x64] ss:$16 sps:$4 sm:$0xff]   ;;  %v5572_v21 = vld [vmem:[#allocation4 + $0x60] ss:$16 sps:$4 sm:$0xff]  }
  0x5c   :  { %516 = vmatprep.subr.bf16.mxu0 %v5498_v32  ;;  %557 = vmatprep.subr.bf16.mxu1 %v5500_v33  ;;  %v5577_v20 = vld [vmem:[#allocation4 + $0x264] ss:$16 sps:$4 sm:$0xff]   ;;  %v5575_v22 = vld [vmem:[#allocation4 + $0x260] ss:$16 sps:$4 sm:$0xff]  }
  0x5d   :  { %v5580_v23 = vld [vmem:[#allocation4 + $0x44] ss:$16 sps:$4 sm:$0xff]   ;;  %v5578_v25 = vld [vmem:[#allocation4 + $0x40] ss:$16 sps:$4 sm:$0xff]  }
  0x5e   :  { %v5583_v24 = vld [vmem:[#allocation4 + $0x244] ss:$16 sps:$4 sm:$0xff]   ;;  %v5581_v26 = vld [vmem:[#allocation4 + $0x240] ss:$16 sps:$4 sm:$0xff]  }
  0x5f   :  { %517 = vmatpush2.bf16.msra.mxu0 %v5502_v34  ;;  %558 = vmatpush2.bf16.msra.mxu1 %v5503_v35  ;;  %v5586_v27 = vld [vmem:[#allocation4 + $0x24] ss:$16 sps:$4 sm:$0xff]   ;;  %v5584_v29 = vld [vmem:[#allocation4 + $0x20] ss:$16 sps:$4 sm:$0xff]  }
  0x60   :  { %518 = vmatprep.subr.bf16.mxu0 %v5504_v36  ;;  %559 = vmatprep.subr.bf16.mxu1 %v5506_v37  ;;  %v5589_v28 = vld [vmem:[#allocation4 + $0x224] ss:$16 sps:$4 sm:$0xff]   ;;  %v5587_v30 = vld [vmem:[#allocation4 + $0x220] ss:$16 sps:$4 sm:$0xff]  }
  0x61   :  { %v5592_v31 = vld [vmem:[#allocation4 + $0x4] ss:$16 sps:$4 sm:$0xff]   ;;  %v5590_v33 = vld [vmem:[#allocation4] ss:$16 sps:$4 sm:$0xff]  }
  0x62   :  { %v5595_v32 = vld [vmem:[#allocation4 + $0x204] ss:$16 sps:$4 sm:$0xff]   ;;  %v5593_v34 = vld [vmem:[#allocation4 + $0x200] ss:$16 sps:$4 sm:$0xff]  }
  0x63   :  { %519 = vmatpush2.bf16.msra.mxu0 %v5508_v38  ;;  %560 = vmatpush2.bf16.msra.mxu1 %v5509_v39  ;;  %v5598_v35 = vld [vmem:[#allocation4 + $0x1e4] ss:$16 sps:$4 sm:$0xff]   ;;  %v5596_v37 = vld [vmem:[#allocation4 + $0x1e0] ss:$16 sps:$4 sm:$0xff]  }
  0x64   :  { %520 = vmatprep.subr.bf16.mxu0 %v5510_v40  ;;  %561 = vmatprep.subr.bf16.mxu1 %v5512_v41  ;;  %v5601_v36 = vld [vmem:[#allocation4 + $0x3e4] ss:$16 sps:$4 sm:$0xff]   ;;  %v5599_v38 = vld [vmem:[#allocation4 + $0x3e0] ss:$16 sps:$4 sm:$0xff]  }
  0x65   :  { %v5604_v39 = vld [vmem:[#allocation4 + $0x1c4] ss:$16 sps:$4 sm:$0xff]   ;;  %v5602_v41 = vld [vmem:[#allocation4 + $0x1c0] ss:$16 sps:$4 sm:$0xff]  }
  0x66   :  { %v5607_v40 = vld [vmem:[#allocation4 + $0x3c4] ss:$16 sps:$4 sm:$0xff]   ;;  %v5611_v46 = vld [vmem:[#allocation4 + $0x3a0] ss:$16 sps:$4 sm:$0xff]  }
  0x67   :  { %521 = vmatpush2.bf16.msra.mxu0 %v5514_v42  ;;  %562 = vmatpush2.bf16.msra.mxu1 %v5515_v43  ;;  %v5605_v42 = vld [vmem:[#allocation4 + $0x3c0] ss:$16 sps:$4 sm:$0xff]   ;;  %v5610_v43 = vld [vmem:[#allocation4 + $0x1a4] ss:$16 sps:$4 sm:$0xff]  }
  0x68   :  { %522 = vmatprep.subr.bf16.mxu0 %v5516_v44  ;;  %563 = vmatprep.subr.bf16.mxu1 %v5518_v45  ;;  %v5613_v44 = vld [vmem:[#allocation4 + $0x3a4] ss:$16 sps:$4 sm:$0xff]   ;;  %v5608_v45 = vld [vmem:[#allocation4 + $0x1a0] ss:$16 sps:$4 sm:$0xff]  }
  0x69   :  { %v5619_v48 = vld [vmem:[#allocation4 + $0x384] ss:$16 sps:$4 sm:$0xff]  }
  0x6b   :  { %523 = vmatpush2.bf16.msra.mxu0 %v5520_v47  ;;  %564 = vmatpush2.bf16.msra.mxu1 %v5521_v49  ;;  %v5616_v47 = vld [vmem:[#allocation4 + $0x184] ss:$16 sps:$4 sm:$0xff]   ;;  %v5614_v49 = vld [vmem:[#allocation4 + $0x180] ss:$16 sps:$4 sm:$0xff]  }
  0x6c   :  { %524 = vmatprep.subr.bf16.mxu0 %v5522_v50  ;;  %565 = vmatprep.subr.bf16.mxu1 %v5524_v51  ;;  %v5617_v50 = vld [vmem:[#allocation4 + $0x380] ss:$16 sps:$4 sm:$0xff]   ;;  %v5622_v51 = vld [vmem:[#allocation4 + $0x164] ss:$16 sps:$4 sm:$0xff]  }
  0x6f   :  { %525 = vmatpush2.bf16.msra.mxu0 %v5526_v52  ;;  %566 = vmatpush2.bf16.msra.mxu1 %v5527_v53  ;;  %v5625_v52 = vld [vmem:[#allocation4 + $0x364] ss:$16 sps:$4 sm:$0xff]   ;;  %v5620_v53 = vld [vmem:[#allocation4 + $0x160] ss:$16 sps:$4 sm:$0xff]  }
  0x70   :  { %526 = vmatprep.subr.bf16.mxu0 %v5528_v54  ;;  %567 = vmatprep.subr.bf16.mxu1 %v5530_v55  ;;  %v5623_v54 = vld [vmem:[#allocation4 + $0x360] ss:$16 sps:$4 sm:$0xff]   ;;  %v5628_v55 = vld [vmem:[#allocation4 + $0x144] ss:$16 sps:$4 sm:$0xff]  }
  0x73   :  { %527 = vmatpush2.bf16.msra.mxu0 %v5532_v56  ;;  %568 = vmatpush2.bf16.msra.mxu1 %v5533_v57  ;;  %v5631_v56 = vld [vmem:[#allocation4 + $0x344] ss:$16 sps:$4 sm:$0xff]   ;;  %v5626_v57 = vld [vmem:[#allocation4 + $0x140] ss:$16 sps:$4 sm:$0xff]  }
  0x74   :  { %528 = vmatprep.subr.bf16.mxu0 %v5534_v58  ;;  %569 = vmatprep.subr.bf16.mxu1 %v5536_v59  ;;  %v5629_v58 = vld [vmem:[#allocation4 + $0x340] ss:$16 sps:$4 sm:$0xff]   ;;  %v5634_v59 = vld [vmem:[#allocation4 + $0x124] ss:$16 sps:$4 sm:$0xff]  }
  0x77   :  { %529 = vmatpush2.bf16.msra.mxu0 %v5538_v60  ;;  %570 = vmatpush2.bf16.msra.mxu1 %v5539_v61  ;;  %v5637_v60 = vld [vmem:[#allocation4 + $0x324] ss:$16 sps:$4 sm:$0xff]   ;;  %v5632_v61 = vld [vmem:[#allocation4 + $0x120] ss:$16 sps:$4 sm:$0xff]  }
  0x78   :  { %530 = vmatprep.subr.bf16.mxu0 %v5540_v62  ;;  %571 = vmatprep.subr.bf16.mxu1 %v5542_v63  ;;  %v5635_v62 = vld [vmem:[#allocation4 + $0x320] ss:$16 sps:$4 sm:$0xff]   ;;  %v5640_v63 = vld [vmem:[#allocation4 + $0x104] ss:$16 sps:$4 sm:$0xff]  }
  0x7b   :  { %531 = vmatpush2.bf16.msra.mxu0 %v5544_v0  ;;  %572 = vmatpush2.bf16.msra.mxu1 %v5545_v1  ;;  %v5643_v0 = vld [vmem:[#allocation4 + $0x304] ss:$16 sps:$4 sm:$0xff]   ;;  %v5638_v1 = vld [vmem:[#allocation4 + $0x100] ss:$16 sps:$4 sm:$0xff]  }
  0x7c   :  { %1374 = vmatprep.subr.bf16.mxu0 %v5550_v2  ;;  %1415 = vmatprep.subr.bf16.mxu1 %v5553_v3  ;;  %v5641_v2 = vld [vmem:[#allocation4 + $0x300] ss:$16 sps:$4 sm:$0xff]   ;;  %v5646_v3 = vld [vmem:[#allocation4 + $0xec] ss:$16 sps:$4 sm:$0xff]  }
  0x7e   :  { %533 = vmatmul.mubr.bf16.vlgmr.msra.gmra.mxu0 %v4786_v4  ;;  %574 = vmatmul.mubr.bf16.vlgmr.msra.gmra.mxu1 %v4786_v4  ;;  %v5649_v4 = vld [vmem:[#allocation4 + $0x2ec] ss:$16 sps:$4 sm:$0xff]  }
  0x7f   :  { %1375 = vmatpush1.bf16.msra.mxu0 %v5548_v5  ;;  %1416 = vmatpush1.bf16.msra.mxu1 %v5551_v6  ;;  %v157_v5 = vlaneseq }
  0x80   :  { %1376 = vmatprep.subr.bf16.mxu0 %v5556_v7  ;;  %1417 = vmatprep.subr.bf16.mxu1 %v5559_v8  ;;  %v6531_v7 = vld [vmem:[#allocation6] sm:$0x1f]  ;;  %v6533_v8 = vld [vmem:[#allocation6 + $0x10] sm:$0x1f] }
  0x81   :  { %v6529_v6 = vshrl.u32 %v157_v5, 7 }
  0x83   :  { %1377 = vmatpush1.bf16.msra.mxu0 %v5554_v9  ;;  %1418 = vmatpush1.bf16.msra.mxu1 %v5557_v10  ;;  %v159_v9 = vsub.s32 0, %v6529_v6  ;;  %v6536_v10 = vld [vmem:[#allocation6 + $0x8] sm:$0x1f] }
  0x84   :  { %1378 = vmatprep.subr.bf16.mxu0 %v5562_v11  ;;  %1419 = vmatprep.subr.bf16.mxu1 %v5565_v12  ;;  %v6538_v11 = vld [vmem:[#allocation6 + $0x18] sm:$0x1f] }
  0x85   :  { %v160_v12 = vrot.slane %v6531_v7, %v159_v9 }
  0x87   :  { %1379 = vmatpush1.bf16.msra.mxu0 %v5560_v13  ;;  %1420 = vmatpush1.bf16.msra.mxu1 %v5563_v14  ;;  %v168_v13 = vrot.slane %v6533_v8, %v159_v9  ;;  %v164_v14 = vrot.slane %v6536_v10, %v159_v9 }
  0x88   :  { %1380 = vmatprep.subr.bf16.mxu0 %v5568_v15  ;;  %1421 = vmatprep.subr.bf16.mxu1 %v5571_v16  ;;  %v172_v15 = vrot.slane %v6538_v11, %v159_v9  ;;  %v5695_v9 = vld [vmem:[#allocation4 + $0x3e8] ss:$16 sps:$4 sm:$0xff]  }
  0x8b   :  { %1381 = vmatpush1.bf16.msra.mxu0 %v5566_v17  ;;  %1422 = vmatpush1.bf16.msra.mxu1 %v5569_v18 }
  0x8c   :  { %1382 = vmatprep.subr.bf16.mxu0 %v5574_v19  ;;  %1423 = vmatprep.subr.bf16.mxu1 %v5577_v20 }
  0x8f   :  { %1383 = vmatpush1.bf16.msra.mxu0 %v5572_v21  ;;  %1424 = vmatpush1.bf16.msra.mxu1 %v5575_v22 }
  0x90   :  { %1384 = vmatprep.subr.bf16.mxu0 %v5580_v23  ;;  %1425 = vmatprep.subr.bf16.mxu1 %v5583_v24 }
  0x93   :  { %1385 = vmatpush1.bf16.msra.mxu0 %v5578_v25  ;;  %1426 = vmatpush1.bf16.msra.mxu1 %v5581_v26 }
  0x94   :  { %1386 = vmatprep.subr.bf16.mxu0 %v5586_v27  ;;  %1427 = vmatprep.subr.bf16.mxu1 %v5589_v28 }
  0x97   :  { %1387 = vmatpush1.bf16.msra.mxu0 %v5584_v29  ;;  %1428 = vmatpush1.bf16.msra.mxu1 %v5587_v30  ;;  %v5644_v30 = vld [vmem:[#allocation4 + $0xe8] ss:$16 sps:$4 sm:$0xff]  }
  0x98   :  { %1388 = vmatprep.subr.bf16.mxu0 %v5592_v31  ;;  %1429 = vmatprep.subr.bf16.mxu1 %v5595_v32  ;;  %v5647_v31 = vld [vmem:[#allocation4 + $0x2e8] ss:$16 sps:$4 sm:$0xff]  }
  0x9b   :  { %1389 = vmatpush1.bf16.msra.mxu0 %v5590_v33  ;;  %1430 = vmatpush1.bf16.msra.mxu1 %v5593_v34 }
  0x9c   :  { %1390 = vmatprep.subr.bf16.mxu0 %v5598_v35  ;;  %1431 = vmatprep.subr.bf16.mxu1 %v5601_v36 }
  0x9f   :  { %1391 = vmatpush2.bf16.msra.mxu0 %v5596_v37  ;;  %1432 = vmatpush2.bf16.msra.mxu1 %v5599_v38  ;;  %v5652_v37 = vld [vmem:[#allocation4 + $0xcc] ss:$16 sps:$4 sm:$0xff]  }
  0xa0   :  { %1392 = vmatprep.subr.bf16.mxu0 %v5604_v39  ;;  %1433 = vmatprep.subr.bf16.mxu1 %v5607_v40  ;;  %v5655_v38 = vld [vmem:[#allocation4 + $0x2cc] ss:$16 sps:$4 sm:$0xff]   ;;  %v5650_v40 = vld [vmem:[#allocation4 + $0xc8] ss:$16 sps:$4 sm:$0xff]  }
  0xa3   :  { %1393 = vmatpush2.bf16.msra.mxu0 %v5602_v41  ;;  %1434 = vmatpush2.bf16.msra.mxu1 %v5605_v42  ;;  %v5653_v41 = vld [vmem:[#allocation4 + $0x2c8] ss:$16 sps:$4 sm:$0xff]   ;;  %v5658_v42 = vld [vmem:[#allocation4 + $0xac] ss:$16 sps:$4 sm:$0xff]  }
  0xa4   :  { %1394 = vmatprep.subr.bf16.mxu0 %v5610_v43  ;;  %1435 = vmatprep.subr.bf16.mxu1 %v5613_v44  ;;  %v5661_v43 = vld [vmem:[#allocation4 + $0x2ac] ss:$16 sps:$4 sm:$0xff]   ;;  %v5656_v44 = vld [vmem:[#allocation4 + $0xa8] ss:$16 sps:$4 sm:$0xff]  }
  0xa7   :  { %1395 = vmatpush2.bf16.msra.mxu0 %v5608_v45  ;;  %1436 = vmatpush2.bf16.msra.mxu1 %v5611_v46  ;;  %v5659_v45 = vld [vmem:[#allocation4 + $0x2a8] ss:$16 sps:$4 sm:$0xff]   ;;  %v5664_v46 = vld [vmem:[#allocation4 + $0x8c] ss:$16 sps:$4 sm:$0xff]  }
  0xa8   :  { %1396 = vmatprep.subr.bf16.mxu0 %v5616_v47  ;;  %1437 = vmatprep.subr.bf16.mxu1 %v5619_v48  ;;  %v5667_v47 = vld [vmem:[#allocation4 + $0x28c] ss:$16 sps:$4 sm:$0xff]   ;;  %v5662_v48 = vld [vmem:[#allocation4 + $0x88] ss:$16 sps:$4 sm:$0xff]  }
  0xab   :  { %1397 = vmatpush2.bf16.msra.mxu0 %v5614_v49  ;;  %1438 = vmatpush2.bf16.msra.mxu1 %v5617_v50  ;;  %v5665_v49 = vld [vmem:[#allocation4 + $0x288] ss:$16 sps:$4 sm:$0xff]   ;;  %v5670_v50 = vld [vmem:[#allocation4 + $0x6c] ss:$16 sps:$4 sm:$0xff]  }
  0xac   :  { %1398 = vmatprep.subr.bf16.mxu0 %v5622_v51  ;;  %1439 = vmatprep.subr.bf16.mxu1 %v5625_v52  ;;  %v5673_v51 = vld [vmem:[#allocation4 + $0x26c] ss:$16 sps:$4 sm:$0xff]   ;;  %v5668_v52 = vld [vmem:[#allocation4 + $0x68] ss:$16 sps:$4 sm:$0xff]  }
  0xaf   :  { %1399 = vmatpush2.bf16.msra.mxu0 %v5620_v53  ;;  %1440 = vmatpush2.bf16.msra.mxu1 %v5623_v54  ;;  %v5671_v53 = vld [vmem:[#allocation4 + $0x268] ss:$16 sps:$4 sm:$0xff]   ;;  %v5676_v54 = vld [vmem:[#allocation4 + $0x4c] ss:$16 sps:$4 sm:$0xff]  }
  0xb0   :  { %1400 = vmatprep.subr.bf16.mxu0 %v5628_v55  ;;  %1441 = vmatprep.subr.bf16.mxu1 %v5631_v56  ;;  %v5679_v55 = vld [vmem:[#allocation4 + $0x24c] ss:$16 sps:$4 sm:$0xff]   ;;  %v5674_v56 = vld [vmem:[#allocation4 + $0x48] ss:$16 sps:$4 sm:$0xff]  }
  0xb3   :  { %1401 = vmatpush2.bf16.msra.mxu0 %v5626_v57  ;;  %1442 = vmatpush2.bf16.msra.mxu1 %v5629_v58  ;;  %v5677_v57 = vld [vmem:[#allocation4 + $0x248] ss:$16 sps:$4 sm:$0xff]   ;;  %v5682_v58 = vld [vmem:[#allocation4 + $0x2c] ss:$16 sps:$4 sm:$0xff]  }
  0xb4   :  { %1402 = vmatprep.subr.bf16.mxu0 %v5634_v59  ;;  %1443 = vmatprep.subr.bf16.mxu1 %v5637_v60  ;;  %v5685_v59 = vld [vmem:[#allocation4 + $0x22c] ss:$16 sps:$4 sm:$0xff]   ;;  %v5680_v60 = vld [vmem:[#allocation4 + $0x28] ss:$16 sps:$4 sm:$0xff]  }
  0xb7   :  { %1403 = vmatpush2.bf16.msra.mxu0 %v5632_v61  ;;  %1444 = vmatpush2.bf16.msra.mxu1 %v5635_v62  ;;  %v5683_v61 = vld [vmem:[#allocation4 + $0x228] ss:$16 sps:$4 sm:$0xff]   ;;  %v5688_v62 = vld [vmem:[#allocation4 + $0xc] ss:$16 sps:$4 sm:$0xff]  }
  0xb8   :  { %1404 = vmatprep.subr.bf16.mxu0 %v5640_v63  ;;  %1445 = vmatprep.subr.bf16.mxu1 %v5643_v0  ;;  %v5691_v63 = vld [vmem:[#allocation4 + $0x20c] ss:$16 sps:$4 sm:$0xff]   ;;  %v5686_v0 = vld [vmem:[#allocation4 + $0x8] ss:$16 sps:$4 sm:$0xff]  }
  0xbb   :  { %1405 = vmatpush2.bf16.msra.mxu0 %v5638_v1  ;;  %1446 = vmatpush2.bf16.msra.mxu1 %v5641_v2  ;;  %v5689_v1 = vld [vmem:[#allocation4 + $0x208] ss:$16 sps:$4 sm:$0xff]   ;;  %v5694_v2 = vld [vmem:[#allocation4 + $0x1ec] ss:$16 sps:$4 sm:$0xff]  }
  0xbc   :  { %1456 = vmatprep.subr.bf16.mxu0 %v5646_v3  ;;  %1497 = vmatprep.subr.bf16.mxu1 %v5649_v4  ;;  %v5697_v3 = vld [vmem:[#allocation4 + $0x3ec] ss:$16 sps:$4 sm:$0xff]   ;;  %v5692_v4 = vld [vmem:[#allocation4 + $0x1e8] ss:$16 sps:$4 sm:$0xff]  }
 0x13e   :  { %v534_v16 = vpop.f32.mrf.mxu0  ;;  %v575_v17 = vpop.f32.mrf.mxu1 }
 0x13f   :  { %v535_v18 = vadd.f32 %v534_v16, %v160_v12  ;;  %v576_v19 = vadd.f32 %v575_v17, %v168_v13  ;;  %v5700_v12 = vld [vmem:[#allocation4 + $0x1cc] ss:$16 sps:$4 sm:$0xff]  }
 0x140   :  { %v536_v20 = vpop.f32.mrf.mxu0  ;;  %v577_v21 = vpop.f32.mrf.mxu1  ;;  %v5703_v13 = vld [vmem:[#allocation4 + $0x3cc] ss:$16 sps:$4 sm:$0xff]  }
 0x141   :  { %v584_v22 = vmax.f32 %v576_v19, 0.0  ;;  %v537_v23 = vadd.f32 %v536_v20, %v164_v14  ;;  %v578_v24 = vadd.f32 %v577_v21, %v172_v15  ;;  %v582_v25 = vmax.f32 %v535_v18, 0.0  ;;  %v5698_v14 = vld [vmem:[#allocation4 + $0x1c8] ss:$16 sps:$4 sm:$0xff]   ;;  %v5706_v16 = vld [vmem:[#allocation4 + $0x1ac] ss:$16 sps:$4 sm:$0xff]  }
 0x142   :  { %v538_v26 = vpop.f32.mrf.mxu0  ;;  %v579_v27 = vpop.f32.mrf.mxu1  ;;  %v5701_v15 = vld [vmem:[#allocation4 + $0x3c8] ss:$16 sps:$4 sm:$0xff]   ;;  %v5709_v17 = vld [vmem:[#allocation4 + $0x3ac] ss:$16 sps:$4 sm:$0xff]  }
 0x143   :  { %v583_v28 = vmax.f32 %v537_v23, 0.0  ;;  %v585_v29 = vmax.f32 %v578_v24, 0.0  ;;  %v6544_v32 = vpack.c.bf16 %v584_v22, %v584_v22  ;;  %v6546_v39 = vpack.c.bf16 %v582_v25, %v582_v25  ;;  %v5704_v18 = vld [vmem:[#allocation4 + $0x1a8] ss:$16 sps:$4 sm:$0xff]   ;;  %v5712_v20 = vld [vmem:[#allocation4 + $0x18c] ss:$16 sps:$4 sm:$0xff]  }
 0x144   :  { %v539_v33 = vpop.f32.mrf.mxu0  ;;  %v580_v34 = vpop.f32.mrf.mxu1  ;;  %v5707_v19 = vld [vmem:[#allocation4 + $0x3a8] ss:$16 sps:$4 sm:$0xff]   ;;  %v5715_v21 = vld [vmem:[#allocation4 + $0x38c] ss:$16 sps:$4 sm:$0xff]  }
 0x145   :  { %v587_v35 = vpack.c.bf16 %v583_v28, %v583_v28  ;;  %v589_v36 = vpack.c.bf16 %v585_v29, %v585_v29  ;;  %v5710_v22 = vld [vmem:[#allocation4 + $0x188] ss:$16 sps:$4 sm:$0xff]   ;;  %v5718_v24 = vld [vmem:[#allocation4 + $0x16c] ss:$16 sps:$4 sm:$0xff]  }
 0x146   :  { %v5713_v23 = vld [vmem:[#allocation4 + $0x388] ss:$16 sps:$4 sm:$0xff]   ;;  %v5721_v25 = vld [vmem:[#allocation4 + $0x36c] ss:$16 sps:$4 sm:$0xff]  }
 0x147   :  { %1406 = vmatprep.mubr.bf16.mxu0 %v587_v35  ;;  %1447 = vmatprep.mubr.bf16.mxu1 %v589_v36  ;;  %v5716_v26 = vld [vmem:[#allocation4 + $0x168] ss:$16 sps:$4 sm:$0xff]   ;;  %v5724_v28 = vld [vmem:[#allocation4 + $0x14c] ss:$16 sps:$4 sm:$0xff]  }
 0x148   :  { %1407 = vmatmul.mubr.bf16.vlgmr.msra.gmra.mxu0 %v6546_v39  ;;  %1448 = vmatmul.mubr.bf16.vlgmr.msra.gmra.mxu1 %v6544_v32  ;;  %v5719_v27 = vld [vmem:[#allocation4 + $0x368] ss:$16 sps:$4 sm:$0xff]   ;;  %v5727_v29 = vld [vmem:[#allocation4 + $0x34c] ss:$16 sps:$4 sm:$0xff]  }
 0x149   :  { %1457 = vmatpush1.bf16.msra.mxu0 %v5644_v30  ;;  %1498 = vmatpush1.bf16.msra.mxu1 %v5647_v31  ;;  %v5722_v30 = vld [vmem:[#allocation4 + $0x148] ss:$16 sps:$4 sm:$0xff]   ;;  %v5730_v33 = vld [vmem:[#allocation4 + $0x12c] ss:$16 sps:$4 sm:$0xff]  }
 0x14a   :  { %1488 = vmatprep.mubr.bf16.mxu0 %v587_v35  ;;  %1529 = vmatprep.mubr.bf16.mxu1 %v589_v36  ;;  %v5725_v31 = vld [vmem:[#allocation4 + $0x348] ss:$16 sps:$4 sm:$0xff]   ;;  %v5733_v34 = vld [vmem:[#allocation4 + $0x32c] ss:$16 sps:$4 sm:$0xff]  }
 0x14b   :  { %1458 = vmatprep.subr.bf16.mxu0 %v5652_v37  ;;  %1499 = vmatprep.subr.bf16.mxu1 %v5655_v38  ;;  %v5728_v35 = vld [vmem:[#allocation4 + $0x128] ss:$16 sps:$4 sm:$0xff]   ;;  %v5736_v37 = vld [vmem:[#allocation4 + $0x10c] ss:$16 sps:$4 sm:$0xff]  }
 0x14c   :  { %v5731_v36 = vld [vmem:[#allocation4 + $0x328] ss:$16 sps:$4 sm:$0xff]   ;;  %v5739_v38 = vld [vmem:[#allocation4 + $0x30c] ss:$16 sps:$4 sm:$0xff]  }
 0x14d   :  { %1459 = vmatpush1.bf16.msra.mxu0 %v5650_v40  ;;  %1500 = vmatpush1.bf16.msra.mxu1 %v5653_v41  ;;  %v5734_v40 = vld [vmem:[#allocation4 + $0x108] ss:$16 sps:$4 sm:$0xff]  }
 0x14e   :  { %1460 = vmatprep.subr.bf16.mxu0 %v5658_v42  ;;  %1501 = vmatprep.subr.bf16.mxu1 %v5661_v43  ;;  %v5737_v41 = vld [vmem:[#allocation4 + $0x308] ss:$16 sps:$4 sm:$0xff]   ;;  %v5742_v42 = vld [vmem:[#allocation4 + $0x4e4] ss:$16 sps:$4 sm:$0xff]   ;;  %v5740_v43 = vld [vmem:[#allocation4 + $0x4e0] ss:$16 sps:$4 sm:$0xff]  }
 0x151   :  { %1461 = vmatpush1.bf16.msra.mxu0 %v5656_v44  ;;  %1502 = vmatpush1.bf16.msra.mxu1 %v5659_v45  ;;  %v5745_v44 = vld [vmem:[#allocation4 + $0x4c4] ss:$16 sps:$4 sm:$0xff]   ;;  %v5743_v45 = vld [vmem:[#allocation4 + $0x4c0] ss:$16 sps:$4 sm:$0xff]  }
 0x152   :  { %1462 = vmatprep.subr.bf16.mxu0 %v5664_v46  ;;  %1503 = vmatprep.subr.bf16.mxu1 %v5667_v47  ;;  %v5748_v46 = vld [vmem:[#allocation4 + $0x4a4] ss:$16 sps:$4 sm:$0xff]   ;;  %v5746_v47 = vld [vmem:[#allocation4 + $0x4a0] ss:$16 sps:$4 sm:$0xff]  }
 0x155   :  { %1463 = vmatpush1.bf16.msra.mxu0 %v5662_v48  ;;  %1504 = vmatpush1.bf16.msra.mxu1 %v5665_v49  ;;  %v5751_v48 = vld [vmem:[#allocation4 + $0x484] ss:$16 sps:$4 sm:$0xff]   ;;  %v5749_v49 = vld [vmem:[#allocation4 + $0x480] ss:$16 sps:$4 sm:$0xff]  }
 0x156   :  { %1464 = vmatprep.subr.bf16.mxu0 %v5670_v50  ;;  %1505 = vmatprep.subr.bf16.mxu1 %v5673_v51  ;;  %v5788_v50 = vld [vmem:[#allocation4 + $0x6e0] ss:$16 sps:$4 sm:$0xff]   ;;  %v5790_v51 = vld [vmem:[#allocation4 + $0x6e4] ss:$16 sps:$4 sm:$0xff]  }
 0x159   :  { %1465 = vmatpush1.bf16.msra.mxu0 %v5668_v52  ;;  %1506 = vmatpush1.bf16.msra.mxu1 %v5671_v53  ;;  %v5754_v52 = vld [vmem:[#allocation4 + $0x464] ss:$16 sps:$4 sm:$0xff]   ;;  %v5794_v53 = vld [vmem:[#allocation4 + $0x6c0] ss:$16 sps:$4 sm:$0xff]  }
 0x15a   :  { %1466 = vmatprep.subr.bf16.mxu0 %v5676_v54  ;;  %1507 = vmatprep.subr.bf16.mxu1 %v5679_v55  ;;  %v5757_v54 = vld [vmem:[#allocation4 + $0x444] ss:$16 sps:$4 sm:$0xff]   ;;  %v5755_v55 = vld [vmem:[#allocation4 + $0x440] ss:$16 sps:$4 sm:$0xff]  }
 0x15d   :  { %1467 = vmatpush1.bf16.msra.mxu0 %v5674_v56  ;;  %1508 = vmatpush1.bf16.msra.mxu1 %v5677_v57  ;;  %v5800_v56 = vld [vmem:[#allocation4 + $0x6a0] ss:$16 sps:$4 sm:$0xff]   ;;  %v5802_v57 = vld [vmem:[#allocation4 + $0x6a4] ss:$16 sps:$4 sm:$0xff]  }
 0x15e   :  { %1468 = vmatprep.subr.bf16.mxu0 %v5682_v58  ;;  %1509 = vmatprep.subr.bf16.mxu1 %v5685_v59  ;;  %v5760_v58 = vld [vmem:[#allocation4 + $0x424] ss:$16 sps:$4 sm:$0xff]   ;;  %v5758_v59 = vld [vmem:[#allocation4 + $0x420] ss:$16 sps:$4 sm:$0xff]  }
 0x161   :  { %1469 = vmatpush1.bf16.msra.mxu0 %v5680_v60  ;;  %1510 = vmatpush1.bf16.msra.mxu1 %v5683_v61  ;;  %v5806_v60 = vld [vmem:[#allocation4 + $0x680] ss:$16 sps:$4 sm:$0xff]   ;;  %v5808_v61 = vld [vmem:[#allocation4 + $0x684] ss:$16 sps:$4 sm:$0xff]  }
 0x162   :  { %1470 = vmatprep.subr.bf16.mxu0 %v5688_v62  ;;  %1511 = vmatprep.subr.bf16.mxu1 %v5691_v63  ;;  %v5763_v62 = vld [vmem:[#allocation4 + $0x404] ss:$16 sps:$4 sm:$0xff]   ;;  %v5761_v63 = vld [vmem:[#allocation4 + $0x400] ss:$16 sps:$4 sm:$0xff]  }
 0x165   :  { %1471 = vmatpush1.bf16.msra.mxu0 %v5686_v0  ;;  %1512 = vmatpush1.bf16.msra.mxu1 %v5689_v1  ;;  %v5812_v0 = vld [vmem:[#allocation4 + $0x660] ss:$16 sps:$4 sm:$0xff]   ;;  %v5814_v1 = vld [vmem:[#allocation4 + $0x664] ss:$16 sps:$4 sm:$0xff]  }
 0x166   :  { %1472 = vmatprep.subr.bf16.mxu0 %v5694_v2  ;;  %1513 = vmatprep.subr.bf16.mxu1 %v5697_v3  ;;  %v5766_v2 = vld [vmem:[#allocation4 + $0x5e4] ss:$16 sps:$4 sm:$0xff]   ;;  %v5764_v3 = vld [vmem:[#allocation4 + $0x5e0] ss:$16 sps:$4 sm:$0xff]  }
 0x169   :  { %1473 = vmatpush2.bf16.msra.mxu0 %v5692_v4  ;;  %1514 = vmatpush2.bf16.msra.mxu1 %v5695_v9  ;;  %v5818_v4 = vld [vmem:[#allocation4 + $0x640] ss:$16 sps:$4 sm:$0xff]   ;;  %v5820_v9 = vld [vmem:[#allocation4 + $0x644] ss:$16 sps:$4 sm:$0xff]  }
 0x16a   :  { %1474 = vmatprep.subr.bf16.mxu0 %v5700_v12  ;;  %1515 = vmatprep.subr.bf16.mxu1 %v5703_v13  ;;  %v5769_v12 = vld [vmem:[#allocation4 + $0x5c4] ss:$16 sps:$4 sm:$0xff]   ;;  %v5767_v13 = vld [vmem:[#allocation4 + $0x5c0] ss:$16 sps:$4 sm:$0xff]  }
 0x16d   :  { %1475 = vmatpush2.bf16.msra.mxu0 %v5698_v14  ;;  %1516 = vmatpush2.bf16.msra.mxu1 %v5701_v15  ;;  %v5824_v14 = vld [vmem:[#allocation4 + $0x620] ss:$16 sps:$4 sm:$0xff]   ;;  %v5826_v15 = vld [vmem:[#allocation4 + $0x624] ss:$16 sps:$4 sm:$0xff]  }
 0x16e   :  { %1476 = vmatprep.subr.bf16.mxu0 %v5706_v16  ;;  %1517 = vmatprep.subr.bf16.mxu1 %v5709_v17  ;;  %v5772_v16 = vld [vmem:[#allocation4 + $0x5a4] ss:$16 sps:$4 sm:$0xff]   ;;  %v5770_v17 = vld [vmem:[#allocation4 + $0x5a0] ss:$16 sps:$4 sm:$0xff]  }
 0x171   :  { %1477 = vmatpush2.bf16.msra.mxu0 %v5704_v18  ;;  %1518 = vmatpush2.bf16.msra.mxu1 %v5707_v19  ;;  %v5830_v18 = vld [vmem:[#allocation4 + $0x600] ss:$16 sps:$4 sm:$0xff]   ;;  %v5832_v19 = vld [vmem:[#allocation4 + $0x604] ss:$16 sps:$4 sm:$0xff]  }
 0x172   :  { %1478 = vmatprep.subr.bf16.mxu0 %v5712_v20  ;;  %1519 = vmatprep.subr.bf16.mxu1 %v5715_v21  ;;  %v5775_v20 = vld [vmem:[#allocation4 + $0x584] ss:$16 sps:$4 sm:$0xff]   ;;  %v5773_v21 = vld [vmem:[#allocation4 + $0x580] ss:$16 sps:$4 sm:$0xff]  }
 0x175   :  { %1479 = vmatpush2.bf16.msra.mxu0 %v5710_v22  ;;  %1520 = vmatpush2.bf16.msra.mxu1 %v5713_v23  ;;  %v5836_v22 = vld [vmem:[#allocation4 + $0x7e0] ss:$16 sps:$4 sm:$0xff]   ;;  %v5838_v23 = vld [vmem:[#allocation4 + $0x7e4] ss:$16 sps:$4 sm:$0xff]  }
 0x176   :  { %1480 = vmatprep.subr.bf16.mxu0 %v5718_v24  ;;  %1521 = vmatprep.subr.bf16.mxu1 %v5721_v25  ;;  %v5778_v24 = vld [vmem:[#allocation4 + $0x564] ss:$16 sps:$4 sm:$0xff]   ;;  %v5776_v25 = vld [vmem:[#allocation4 + $0x560] ss:$16 sps:$4 sm:$0xff]  }
 0x179   :  { %1481 = vmatpush2.bf16.msra.mxu0 %v5716_v26  ;;  %1522 = vmatpush2.bf16.msra.mxu1 %v5719_v27  ;;  %v5842_v26 = vld [vmem:[#allocation4 + $0x7c0] ss:$16 sps:$4 sm:$0xff]   ;;  %v5844_v27 = vld [vmem:[#allocation4 + $0x7c4] ss:$16 sps:$4 sm:$0xff]  }
 0x17a   :  { %1482 = vmatprep.subr.bf16.mxu0 %v5724_v28  ;;  %1523 = vmatprep.subr.bf16.mxu1 %v5727_v29  ;;  %v5781_v28 = vld [vmem:[#allocation4 + $0x544] ss:$16 sps:$4 sm:$0xff]   ;;  %v5779_v29 = vld [vmem:[#allocation4 + $0x540] ss:$16 sps:$4 sm:$0xff]  }
 0x17d   :  { %1483 = vmatpush2.bf16.msra.mxu0 %v5722_v30  ;;  %1524 = vmatpush2.bf16.msra.mxu1 %v5725_v31  ;;  %v5848_v30 = vld [vmem:[#allocation4 + $0x7a0] ss:$16 sps:$4 sm:$0xff]   ;;  %v5850_v31 = vld [vmem:[#allocation4 + $0x7a4] ss:$16 sps:$4 sm:$0xff]  }
 0x17e   :  { %1484 = vmatprep.subr.bf16.mxu0 %v5730_v33  ;;  %1525 = vmatprep.subr.bf16.mxu1 %v5733_v34  ;;  %v5784_v33 = vld [vmem:[#allocation4 + $0x524] ss:$16 sps:$4 sm:$0xff]   ;;  %v5782_v34 = vld [vmem:[#allocation4 + $0x520] ss:$16 sps:$4 sm:$0xff]  }
 0x181   :  { %1485 = vmatpush2.bf16.msra.mxu0 %v5728_v35  ;;  %1526 = vmatpush2.bf16.msra.mxu1 %v5731_v36  ;;  %v5854_v35 = vld [vmem:[#allocation4 + $0x780] ss:$16 sps:$4 sm:$0xff]   ;;  %v5856_v36 = vld [vmem:[#allocation4 + $0x784] ss:$16 sps:$4 sm:$0xff]  }
 0x182   :  { %1486 = vmatprep.subr.bf16.mxu0 %v5736_v37  ;;  %1527 = vmatprep.subr.bf16.mxu1 %v5739_v38  ;;  %v5787_v37 = vld [vmem:[#allocation4 + $0x504] ss:$16 sps:$4 sm:$0xff]   ;;  %v5785_v38 = vld [vmem:[#allocation4 + $0x500] ss:$16 sps:$4 sm:$0xff]  }
 0x185   :  { %1487 = vmatpush2.bf16.msra.mxu0 %v5734_v40  ;;  %1528 = vmatpush2.bf16.msra.mxu1 %v5737_v41  ;;  %v5860_v40 = vld [vmem:[#allocation4 + $0x760] ss:$16 sps:$4 sm:$0xff]   ;;  %v5862_v41 = vld [vmem:[#allocation4 + $0x764] ss:$16 sps:$4 sm:$0xff]  }
 0x186   :  { %2331 = vmatprep.subr.bf16.mxu0 %v5742_v42  ;;  %2372 = vmatprep.subr.bf16.mxu1 %v5790_v51  ;;  %v5793_v42 = vld [vmem:[#allocation4 + $0x4ec] ss:$16 sps:$4 sm:$0xff]  }
 0x188   :  { %1489 = vmatmul.mubr.bf16.vlgmr.msra.gmra.mxu0 %v6546_v39  ;;  %1530 = vmatmul.mubr.bf16.vlgmr.msra.gmra.mxu1 %v6544_v32  ;;  %v5752_v39 = vld [vmem:[#allocation4 + $0x460] ss:$16 sps:$4 sm:$0xff]   ;;  %v5796_v32 = vld [vmem:[#allocation4 + $0x6c4] ss:$16 sps:$4 sm:$0xff]  }
 0x189   :  { %2332 = vmatpush1.bf16.msra.mxu0 %v5740_v43  ;;  %2373 = vmatpush1.bf16.msra.mxu1 %v5788_v50  ;;  %v5866_v43 = vld [vmem:[#allocation4 + $0x740] ss:$16 sps:$4 sm:$0xff]   ;;  %v6553_v50 = vsub.s32 1, %v6529_v6 }
 0x18a   :  { %2333 = vmatprep.subr.bf16.mxu0 %v5745_v44  ;;  %2374 = vmatprep.subr.bf16.mxu1 %v5796_v32  ;;  %v5868_v44 = vld [vmem:[#allocation4 + $0x744] ss:$16 sps:$4 sm:$0xff]  }
 0x18b   :  { %v721_v51 = vrot.slane %v6531_v7, %v6553_v50 }
 0x18d   :  { %2334 = vmatpush1.bf16.msra.mxu0 %v5743_v45  ;;  %2375 = vmatpush1.bf16.msra.mxu1 %v5794_v53  ;;  %v5874_v45 = vld [vmem:[#allocation4 + $0x724] ss:$16 sps:$4 sm:$0xff]  }
 0x18e   :  { %2335 = vmatprep.subr.bf16.mxu0 %v5748_v46  ;;  %2376 = vmatprep.subr.bf16.mxu1 %v5802_v57  ;;  %v5872_v46 = vld [vmem:[#allocation4 + $0x720] ss:$16 sps:$4 sm:$0xff]  }
 0x191   :  { %2336 = vmatpush1.bf16.msra.mxu0 %v5746_v47  ;;  %2377 = vmatpush1.bf16.msra.mxu1 %v5800_v56  ;;  %v5880_v47 = vld [vmem:[#allocation4 + $0x704] ss:$16 sps:$4 sm:$0xff]  }
 0x192   :  { %2337 = vmatprep.subr.bf16.mxu0 %v5751_v48  ;;  %2378 = vmatprep.subr.bf16.mxu1 %v5808_v61  ;;  %v5878_v48 = vld [vmem:[#allocation4 + $0x700] ss:$16 sps:$4 sm:$0xff]  }
 0x195   :  { %2338 = vmatpush1.bf16.msra.mxu0 %v5749_v49  ;;  %2379 = vmatpush1.bf16.msra.mxu1 %v5806_v60  ;;  %v5886_v49 = vld [vmem:[#allocation4 + $0x6ec] ss:$16 sps:$4 sm:$0xff]  }
 0x196   :  { %2339 = vmatprep.subr.bf16.mxu0 %v5754_v52  ;;  %2380 = vmatprep.subr.bf16.mxu1 %v5814_v1  ;;  %v725_v52 = vrot.slane %v6536_v10, %v6553_v50  ;;  %v5797_v10 = vld [vmem:[#allocation4 + $0x4c8] ss:$16 sps:$4 sm:$0xff]  }
 0x199   :  { %2340 = vmatpush1.bf16.msra.mxu0 %v5752_v39  ;;  %2381 = vmatpush1.bf16.msra.mxu1 %v5812_v0 }
 0x19a   :  { %2341 = vmatprep.subr.bf16.mxu0 %v5757_v54  ;;  %2382 = vmatprep.subr.bf16.mxu1 %v5820_v9  ;;  %v5803_v9 = vld [vmem:[#allocation4 + $0x4a8] ss:$16 sps:$4 sm:$0xff]  }
 0x19d   :  { %2342 = vmatpush1.bf16.msra.mxu0 %v5755_v55  ;;  %2383 = vmatpush1.bf16.msra.mxu1 %v5818_v4  ;;  %v5805_v4 = vld [vmem:[#allocation4 + $0x4ac] ss:$16 sps:$4 sm:$0xff]  }
 0x19e   :  { %2343 = vmatprep.subr.bf16.mxu0 %v5760_v58  ;;  %2384 = vmatprep.subr.bf16.mxu1 %v5826_v15  ;;  %v5815_v15 = vld [vmem:[#allocation4 + $0x468] ss:$16 sps:$4 sm:$0xff]  }
 0x1a1   :  { %2344 = vmatpush1.bf16.msra.mxu0 %v5758_v59  ;;  %2385 = vmatpush1.bf16.msra.mxu1 %v5824_v14  ;;  %v5817_v14 = vld [vmem:[#allocation4 + $0x46c] ss:$16 sps:$4 sm:$0xff]  }
 0x1a2   :  { %2345 = vmatprep.subr.bf16.mxu0 %v5763_v62  ;;  %2386 = vmatprep.subr.bf16.mxu1 %v5832_v19  ;;  %v5827_v19 = vld [vmem:[#allocation4 + $0x428] ss:$16 sps:$4 sm:$0xff]  }
 0x1a5   :  { %2346 = vmatpush1.bf16.msra.mxu0 %v5761_v63  ;;  %2387 = vmatpush1.bf16.msra.mxu1 %v5830_v18  ;;  %v5829_v18 = vld [vmem:[#allocation4 + $0x42c] ss:$16 sps:$4 sm:$0xff]  }
 0x1a6   :  { %2347 = vmatprep.subr.bf16.mxu0 %v5766_v2  ;;  %2388 = vmatprep.subr.bf16.mxu1 %v5838_v23  ;;  %v5791_v2 = vld [vmem:[#allocation4 + $0x4e8] ss:$16 sps:$4 sm:$0xff]  }
 0x1a7   :  { %v5839_v23 = vld [vmem:[#allocation4 + $0x5e8] ss:$16 sps:$4 sm:$0xff]  }
 0x1a9   :  { %2348 = vmatpush2.bf16.msra.mxu0 %v5764_v3  ;;  %2389 = vmatpush2.bf16.msra.mxu1 %v5836_v22  ;;  %v5799_v3 = vld [vmem:[#allocation4 + $0x4cc] ss:$16 sps:$4 sm:$0xff]  }
 0x1aa   :  { %2349 = vmatprep.subr.bf16.mxu0 %v5769_v12  ;;  %2390 = vmatprep.subr.bf16.mxu1 %v5844_v27  ;;  %v5811_v12 = vld [vmem:[#allocation4 + $0x48c] ss:$16 sps:$4 sm:$0xff]   ;;  %v5851_v27 = vld [vmem:[#allocation4 + $0x5a8] ss:$16 sps:$4 sm:$0xff]  }
 0x1ab   :  { %v5841_v22 = vld [vmem:[#allocation4 + $0x5ec] ss:$16 sps:$4 sm:$0xff]  }
 0x1ad   :  { %2350 = vmatpush2.bf16.msra.mxu0 %v5767_v13  ;;  %2391 = vmatpush2.bf16.msra.mxu1 %v5842_v26  ;;  %v5809_v13 = vld [vmem:[#allocation4 + $0x488] ss:$16 sps:$4 sm:$0xff]   ;;  %v5853_v26 = vld [vmem:[#allocation4 + $0x5ac] ss:$16 sps:$4 sm:$0xff]  }
 0x1ae   :  { %2351 = vmatprep.subr.bf16.mxu0 %v5772_v16  ;;  %2392 = vmatprep.subr.bf16.mxu1 %v5850_v31  ;;  %v5823_v16 = vld [vmem:[#allocation4 + $0x44c] ss:$16 sps:$4 sm:$0xff]   ;;  %v5863_v31 = vld [vmem:[#allocation4 + $0x568] ss:$16 sps:$4 sm:$0xff]  }
 0x1b1   :  { %2352 = vmatpush2.bf16.msra.mxu0 %v5770_v17  ;;  %2393 = vmatpush2.bf16.msra.mxu1 %v5848_v30  ;;  %v5821_v17 = vld [vmem:[#allocation4 + $0x448] ss:$16 sps:$4 sm:$0xff]   ;;  %v5865_v30 = vld [vmem:[#allocation4 + $0x56c] ss:$16 sps:$4 sm:$0xff]  }
 0x1b2   :  { %2353 = vmatprep.subr.bf16.mxu0 %v5775_v20  ;;  %2394 = vmatprep.subr.bf16.mxu1 %v5856_v36  ;;  %v5835_v20 = vld [vmem:[#allocation4 + $0x40c] ss:$16 sps:$4 sm:$0xff]  }
 0x1b3   :  { %v5877_v36 = vld [vmem:[#allocation4 + $0x52c] ss:$16 sps:$4 sm:$0xff]  }
 0x1b5   :  { %2354 = vmatpush2.bf16.msra.mxu0 %v5773_v21  ;;  %2395 = vmatpush2.bf16.msra.mxu1 %v5854_v35  ;;  %v5833_v21 = vld [vmem:[#allocation4 + $0x408] ss:$16 sps:$4 sm:$0xff]  }
 0x1b6   :  { %2355 = vmatprep.subr.bf16.mxu0 %v5778_v24  ;;  %2396 = vmatprep.subr.bf16.mxu1 %v5862_v41  ;;  %v5847_v24 = vld [vmem:[#allocation4 + $0x5cc] ss:$16 sps:$4 sm:$0xff]   ;;  %v5869_v35 = vld [vmem:[#allocation4 + $0x548] ss:$16 sps:$4 sm:$0xff]  }
 0x1b9   :  { %2356 = vmatpush2.bf16.msra.mxu0 %v5776_v25  ;;  %2397 = vmatpush2.bf16.msra.mxu1 %v5860_v40  ;;  %v5845_v25 = vld [vmem:[#allocation4 + $0x5c8] ss:$16 sps:$4 sm:$0xff]  }
 0x1ba   :  { %2357 = vmatprep.subr.bf16.mxu0 %v5781_v28  ;;  %2398 = vmatprep.subr.bf16.mxu1 %v5868_v44  ;;  %v5859_v28 = vld [vmem:[#allocation4 + $0x58c] ss:$16 sps:$4 sm:$0xff]  }
 0x1bd   :  { %2358 = vmatpush2.bf16.msra.mxu0 %v5779_v29  ;;  %2399 = vmatpush2.bf16.msra.mxu1 %v5866_v43  ;;  %v5857_v29 = vld [vmem:[#allocation4 + $0x588] ss:$16 sps:$4 sm:$0xff]  }
 0x1be   :  { %2359 = vmatprep.subr.bf16.mxu0 %v5784_v33  ;;  %2400 = vmatprep.subr.bf16.mxu1 %v5874_v45  ;;  %v5871_v33 = vld [vmem:[#allocation4 + $0x54c] ss:$16 sps:$4 sm:$0xff]  }
 0x1bf   :  { %v5883_v45 = vld [vmem:[#allocation4 + $0x50c] ss:$16 sps:$4 sm:$0xff]  }
 0x1c1   :  { %2360 = vmatpush2.bf16.msra.mxu0 %v5782_v34  ;;  %2401 = vmatpush2.bf16.msra.mxu1 %v5872_v46  ;;  %v729_v34 = vrot.slane %v6533_v8, %v6553_v50 }
 0x1c2   :  { %2361 = vmatprep.subr.bf16.mxu0 %v5787_v37  ;;  %2402 = vmatprep.subr.bf16.mxu1 %v5880_v47  ;;  %v733_v37 = vrot.slane %v6538_v11, %v6553_v50 }
 0x1c5   :  { %2362 = vmatpush2.bf16.msra.mxu0 %v5785_v38  ;;  %2403 = vmatpush2.bf16.msra.mxu1 %v5878_v48 }
 0x1c6   :  { %2413 = vmatprep.subr.bf16.mxu0 %v5793_v42  ;;  %2454 = vmatprep.subr.bf16.mxu1 %v5886_v49  ;;  %v5875_v42 = vld [vmem:[#allocation4 + $0x528] ss:$16 sps:$4 sm:$0xff]  }
 0x208   :  { %v1408_v39 = vpop.f32.mrf.mxu0  ;;  %v1449_v53 = vpop.f32.mrf.mxu1 }
 0x209   :  { %v1409_v32 = vadd.f32 %v1408_v39, %v721_v51  ;;  %v5881_v51 = vld [vmem:[#allocation4 + $0x508] ss:$16 sps:$4 sm:$0xff]  }
 0x20a   :  { %v1410_v54 = vpop.f32.mrf.mxu0  ;;  %v1451_v55 = vpop.f32.mrf.mxu1 }
 0x20b   :  { %v1450_v56 = vadd.f32 %v1449_v53, %v1409_v32  ;;  %v1411_v57 = vadd.f32 %v1410_v54, %v725_v52  ;;  %v5884_v32 = vld [vmem:[#allocation4 + $0x6e8] ss:$16 sps:$4 sm:$0xff]  }
 0x20c   :  { %v1412_v58 = vpop.f32.mrf.mxu0  ;;  %v1453_v59 = vpop.f32.mrf.mxu1 }
 0x20d   :  { %v1452_v60 = vadd.f32 %v1451_v55, %v1411_v57  ;;  %v1538_v61 = vmax.f32 %v1450_v56, 0.0  ;;  %v5889_v55 = vld [vmem:[#allocation4 + $0x6cc] ss:$16 sps:$4 sm:$0xff]   ;;  %v5887_v56 = vld [vmem:[#allocation4 + $0x6c8] ss:$16 sps:$4 sm:$0xff]  }
 0x20e   :  { %v1413_v62 = vpop.f32.mrf.mxu0  ;;  %v1454_v63 = vpop.f32.mrf.mxu1  ;;  %v5892_v57 = vld [vmem:[#allocation4 + $0x6ac] ss:$16 sps:$4 sm:$0xff]   ;;  %v5890_v58 = vld [vmem:[#allocation4 + $0x6a8] ss:$16 sps:$4 sm:$0xff]  }
 0x20f   :  { %v1539_v0 = vmax.f32 %v1452_v60, 0.0  ;;  %v6559_v7 = vpack.c.bf16 %v1538_v61, %v1538_v61  ;;  %v5895_v59 = vld [vmem:[#allocation4 + $0x68c] ss:$16 sps:$4 sm:$0xff]   ;;  %v5932_v60 = vld [vmem:[#allocation4 + $0x8e0] ss:$16 sps:$4 sm:$0xff]  }
 0x210   :  { %v5934_v61 = vld [vmem:[#allocation4 + $0x8e4] ss:$16 sps:$4 sm:$0xff]   ;;  %v5893_v63 = vld [vmem:[#allocation4 + $0x688] ss:$16 sps:$4 sm:$0xff]  }
 0x211   :  { %v1543_v1 = vpack.c.bf16 %v1539_v0, %v1539_v0  ;;  %v5937_v62 = vld [vmem:[#allocation4 + $0x8c4] ss:$16 sps:$4 sm:$0xff]   ;;  %v5935_v0 = vld [vmem:[#allocation4 + $0x8c0] ss:$16 sps:$4 sm:$0xff]  }
 0x213   :  { %2363 = vmatprep.mubr.bf16.mxu0 %v1543_v1 }
 0x214   :  { %2364 = vmatmul.mubr.bf16.vlgmr.msra.gmra.mxu0 %v6559_v7 }
 0x215   :  { %2414 = vmatpush1.bf16.msra.mxu0 %v5791_v2  ;;  %2445 = vmatprep.mubr.bf16.mxu0 %v1543_v1  ;;  %v5898_v1 = vld [vmem:[#allocation4 + $0x66c] ss:$16 sps:$4 sm:$0xff]   ;;  %v5940_v2 = vld [vmem:[#allocation4 + $0x8a4] ss:$16 sps:$4 sm:$0xff]  }
 0x216   :  { %2415 = vmatprep.subr.bf16.mxu0 %v5799_v3  ;;  %v5938_v3 = vld [vmem:[#allocation4 + $0x8a0] ss:$16 sps:$4 sm:$0xff]  }
 0x219   :  { %2416 = vmatpush1.bf16.msra.mxu0 %v5797_v10  ;;  %v5901_v10 = vld [vmem:[#allocation4 + $0x64c] ss:$16 sps:$4 sm:$0xff]  }
 0x21a   :  { %2417 = vmatprep.subr.bf16.mxu0 %v5805_v4  ;;  %v5943_v4 = vld [vmem:[#allocation4 + $0x884] ss:$16 sps:$4 sm:$0xff]  }
 0x21d   :  { %2418 = vmatpush1.bf16.msra.mxu0 %v5803_v9  ;;  %v5899_v9 = vld [vmem:[#allocation4 + $0x648] ss:$16 sps:$4 sm:$0xff]  }
 0x21e   :  { %2419 = vmatprep.subr.bf16.mxu0 %v5811_v12  ;;  %v5941_v12 = vld [vmem:[#allocation4 + $0x880] ss:$16 sps:$4 sm:$0xff]  }
 0x221   :  { %2420 = vmatpush1.bf16.msra.mxu0 %v5809_v13  ;;  %v5904_v13 = vld [vmem:[#allocation4 + $0x62c] ss:$16 sps:$4 sm:$0xff]  }
 0x222   :  { %2421 = vmatprep.subr.bf16.mxu0 %v5817_v14  ;;  %v5946_v14 = vld [vmem:[#allocation4 + $0x864] ss:$16 sps:$4 sm:$0xff]  }
 0x225   :  { %2422 = vmatpush1.bf16.msra.mxu0 %v5815_v15  ;;  %v5902_v15 = vld [vmem:[#allocation4 + $0x628] ss:$16 sps:$4 sm:$0xff]  }
 0x226   :  { %2423 = vmatprep.subr.bf16.mxu0 %v5823_v16  ;;  %v5944_v16 = vld [vmem:[#allocation4 + $0x860] ss:$16 sps:$4 sm:$0xff]  }
 0x229   :  { %2424 = vmatpush1.bf16.msra.mxu0 %v5821_v17  ;;  %v5907_v17 = vld [vmem:[#allocation4 + $0x60c] ss:$16 sps:$4 sm:$0xff]  }
 0x22a   :  { %2425 = vmatprep.subr.bf16.mxu0 %v5829_v18  ;;  %v5949_v18 = vld [vmem:[#allocation4 + $0x844] ss:$16 sps:$4 sm:$0xff]  }
 0x22d   :  { %2426 = vmatpush1.bf16.msra.mxu0 %v5827_v19  ;;  %v5905_v19 = vld [vmem:[#allocation4 + $0x608] ss:$16 sps:$4 sm:$0xff]  }
 0x22e   :  { %2427 = vmatprep.subr.bf16.mxu0 %v5835_v20  ;;  %v5947_v20 = vld [vmem:[#allocation4 + $0x840] ss:$16 sps:$4 sm:$0xff]  }
 0x231   :  { %2428 = vmatpush1.bf16.msra.mxu0 %v5833_v21  ;;  %v5910_v21 = vld [vmem:[#allocation4 + $0x7ec] ss:$16 sps:$4 sm:$0xff]  }
 0x232   :  { %2429 = vmatprep.subr.bf16.mxu0 %v5841_v22  ;;  %v5952_v22 = vld [vmem:[#allocation4 + $0x824] ss:$16 sps:$4 sm:$0xff]  }
 0x235   :  { %2430 = vmatpush2.bf16.msra.mxu0 %v5839_v23  ;;  %v5908_v23 = vld [vmem:[#allocation4 + $0x7e8] ss:$16 sps:$4 sm:$0xff]  }
 0x236   :  { %2431 = vmatprep.subr.bf16.mxu0 %v5847_v24  ;;  %v5950_v24 = vld [vmem:[#allocation4 + $0x820] ss:$16 sps:$4 sm:$0xff]  }
 0x239   :  { %2432 = vmatpush2.bf16.msra.mxu0 %v5845_v25  ;;  %v5913_v25 = vld [vmem:[#allocation4 + $0x7cc] ss:$16 sps:$4 sm:$0xff]  }
 0x23a   :  { %2433 = vmatprep.subr.bf16.mxu0 %v5853_v26  ;;  %v5955_v26 = vld [vmem:[#allocation4 + $0x804] ss:$16 sps:$4 sm:$0xff]  }
 0x23d   :  { %2434 = vmatpush2.bf16.msra.mxu0 %v5851_v27  ;;  %v5911_v27 = vld [vmem:[#allocation4 + $0x7c8] ss:$16 sps:$4 sm:$0xff]  }
 0x23e   :  { %2435 = vmatprep.subr.bf16.mxu0 %v5859_v28  ;;  %v5953_v28 = vld [vmem:[#allocation4 + $0x800] ss:$16 sps:$4 sm:$0xff]  }
 0x241   :  { %2436 = vmatpush2.bf16.msra.mxu0 %v5857_v29  ;;  %v5916_v29 = vld [vmem:[#allocation4 + $0x7ac] ss:$16 sps:$4 sm:$0xff]  }
 0x242   :  { %2437 = vmatprep.subr.bf16.mxu0 %v5865_v30  ;;  %v5958_v30 = vld [vmem:[#allocation4 + $0x9e4] ss:$16 sps:$4 sm:$0xff]  }
 0x245   :  { %2438 = vmatpush2.bf16.msra.mxu0 %v5863_v31  ;;  %v5914_v31 = vld [vmem:[#allocation4 + $0x7a8] ss:$16 sps:$4 sm:$0xff]  }
 0x246   :  { %2439 = vmatprep.subr.bf16.mxu0 %v5871_v33  ;;  %v5956_v33 = vld [vmem:[#allocation4 + $0x9e0] ss:$16 sps:$4 sm:$0xff]  }
 0x248   :  { %v1490_v38 = vpop.f32.mrf.mxu0  ;;  %v1531_v40 = vpop.f32.mrf.mxu1 }
 0x249   :  { %v1491_v41 = vadd.f32 %v1490_v38, %v729_v34  ;;  %2440 = vmatpush2.bf16.msra.mxu0 %v5869_v35  ;;  %v5919_v34 = vld [vmem:[#allocation4 + $0x78c] ss:$16 sps:$4 sm:$0xff]   ;;  %v5961_v35 = vld [vmem:[#allocation4 + $0x9c4] ss:$16 sps:$4 sm:$0xff]  }
 0x24a   :  { %v1492_v43 = vpop.f32.mrf.mxu0  ;;  %v1533_v44 = vpop.f32.mrf.mxu1  ;;  %2441 = vmatprep.subr.bf16.mxu0 %v5877_v36  ;;  %v5917_v36 = vld [vmem:[#allocation4 + $0x788] ss:$16 sps:$4 sm:$0xff]   ;;  %v5922_v38 = vld [vmem:[#allocation4 + $0x76c] ss:$16 sps:$4 sm:$0xff]  }
 0x24b   :  { %v1532_v46 = vadd.f32 %v1531_v40, %v1491_v41  ;;  %v1493_v47 = vadd.f32 %v1492_v43, %v733_v37  ;;  %v5959_v37 = vld [vmem:[#allocation4 + $0x9c0] ss:$16 sps:$4 sm:$0xff]   ;;  %v5964_v40 = vld [vmem:[#allocation4 + $0x9a4] ss:$16 sps:$4 sm:$0xff]   ;;  %v5920_v41 = vld [vmem:[#allocation4 + $0x768] ss:$16 sps:$4 sm:$0xff]  }
 0x24c   :  { %v1494_v48 = vpop.f32.mrf.mxu0  ;;  %v1535_v49 = vpop.f32.mrf.mxu1  ;;  %v5925_v43 = vld [vmem:[#allocation4 + $0x74c] ss:$16 sps:$4 sm:$0xff]  }
 0x24d   :  { %v1534_v8 = vadd.f32 %v1533_v44, %v1493_v47  ;;  %2442 = vmatpush2.bf16.msra.mxu0 %v5875_v42  ;;  %v1540_v52 = vmax.f32 %v1532_v46, 0.0  ;;  %v5962_v42 = vld [vmem:[#allocation4 + $0x9a0] ss:$16 sps:$4 sm:$0xff]   ;;  %v5967_v44 = vld [vmem:[#allocation4 + $0x984] ss:$16 sps:$4 sm:$0xff]  }
 0x24e   :  { %v1495_v39 = vpop.f32.mrf.mxu0  ;;  %v1536_v53 = vpop.f32.mrf.mxu1  ;;  %2443 = vmatprep.subr.bf16.mxu0 %v5883_v45  ;;  %v5923_v45 = vld [vmem:[#allocation4 + $0x748] ss:$16 sps:$4 sm:$0xff]   ;;  %v5965_v46 = vld [vmem:[#allocation4 + $0x980] ss:$16 sps:$4 sm:$0xff]   ;;  %v5928_v47 = vld [vmem:[#allocation4 + $0x72c] ss:$16 sps:$4 sm:$0xff]  }
 0x24f   :  { %v1541_v11 = vmax.f32 %v1534_v8, 0.0  ;;  %v6566_v54 = vpack.c.bf16 %v1540_v52, %v1540_v52  ;;  %v5970_v48 = vld [vmem:[#allocation4 + $0x964] ss:$16 sps:$4 sm:$0xff]   ;;  %v5926_v49 = vld [vmem:[#allocation4 + $0x728] ss:$16 sps:$4 sm:$0xff]  }
 0x250   :  { %v5968_v8 = vld [vmem:[#allocation4 + $0x960] ss:$16 sps:$4 sm:$0xff]   ;;  %v5973_v52 = vld [vmem:[#allocation4 + $0x944] ss:$16 sps:$4 sm:$0xff]   ;;  %v5929_v39 = vld [vmem:[#allocation4 + $0x708] ss:$16 sps:$4 sm:$0xff]  }
 0x251   :  { %v1545_v50 = vpack.c.bf16 %v1541_v11, %v1541_v11  ;;  %2444 = vmatpush2.bf16.msra.mxu0 %v5881_v51  ;;  %v5931_v51 = vld [vmem:[#allocation4 + $0x70c] ss:$16 sps:$4 sm:$0xff]   ;;  %v5971_v53 = vld [vmem:[#allocation4 + $0x940] ss:$16 sps:$4 sm:$0xff]   ;;  %v5976_v11 = vld [vmem:[#allocation4 + $0x924] ss:$16 sps:$4 sm:$0xff]  }
 0x252   :  { %3288 = vmatprep.subr.bf16.mxu0 %v5934_v61  ;;  %v5992_v61 = vld [vmem:[#allocation4 + $0xaa0] ss:$16 sps:$4 sm:$0xff]  }
 0x253   :  { %2404 = vmatprep.mubr.bf16.mxu1 %v1545_v50 }
 0x254   :  { %2405 = vmatmul.mubr.bf16.vlgmr.msra.gmra.mxu1 %v6566_v54  ;;  %2446 = vmatmul.mubr.bf16.vlgmr.msra.gmra.mxu0 %v6559_v7  ;;  %v5896_v7 = vld [vmem:[#allocation4 + $0x668] ss:$16 sps:$4 sm:$0xff]  }
 0x255   :  { %2455 = vmatpush1.bf16.msra.mxu1 %v5884_v32  ;;  %2486 = vmatprep.mubr.bf16.mxu1 %v1545_v50  ;;  %v5974_v50 = vld [vmem:[#allocation4 + $0x920] ss:$16 sps:$4 sm:$0xff]   ;;  %v5979_v32 = vld [vmem:[#allocation4 + $0x904] ss:$16 sps:$4 sm:$0xff]  }
 0x256   :  { %2456 = vmatprep.subr.bf16.mxu1 %v5889_v55  ;;  %3289 = vmatpush1.bf16.msra.mxu0 %v5932_v60  ;;  %v5977_v55 = vld [vmem:[#allocation4 + $0x900] ss:$16 sps:$4 sm:$0xff]   ;;  %v5988_v60 = vld [vmem:[#allocation4 + $0xac4] ss:$16 sps:$4 sm:$0xff]  }
 0x257   :  { %3290 = vmatprep.subr.bf16.mxu0 %v5937_v62  ;;  %v5998_v62 = vld [vmem:[#allocation4 + $0xa80] ss:$16 sps:$4 sm:$0xff]  }
 0x259   :  { %2457 = vmatpush1.bf16.msra.mxu1 %v5887_v56  ;;  %v5980_v56 = vld [vmem:[#allocation4 + $0xae0] ss:$16 sps:$4 sm:$0xff]  }
 0x25a   :  { %2458 = vmatprep.subr.bf16.mxu1 %v5892_v57  ;;  %3291 = vmatpush1.bf16.msra.mxu0 %v5935_v0  ;;  %v5982_v57 = vld [vmem:[#allocation4 + $0xae4] ss:$16 sps:$4 sm:$0xff]   ;;  %v6004_v0 = vld [vmem:[#allocation4 + $0xa60] ss:$16 sps:$4 sm:$0xff]  }
 0x25b   :  { %3292 = vmatprep.subr.bf16.mxu0 %v5940_v2  ;;  %v6010_v2 = vld [vmem:[#allocation4 + $0xa40] ss:$16 sps:$4 sm:$0xff]  }
 0x25d   :  { %2459 = vmatpush1.bf16.msra.mxu1 %v5890_v58  ;;  %v5985_v58 = vld [vmem:[#allocation4 + $0x8ec] ss:$16 sps:$4 sm:$0xff]  }
 0x25e   :  { %2460 = vmatprep.subr.bf16.mxu1 %v5895_v59  ;;  %3293 = vmatpush1.bf16.msra.mxu0 %v5938_v3  ;;  %v5986_v59 = vld [vmem:[#allocation4 + $0xac0] ss:$16 sps:$4 sm:$0xff]  }
 0x25f   :  { %3294 = vmatprep.subr.bf16.mxu0 %v5943_v4  ;;  %v6016_v3 = vld [vmem:[#allocation4 + $0xa20] ss:$16 sps:$4 sm:$0xff]  }
 0x260   :  { %v6022_v4 = vld [vmem:[#allocation4 + $0xa00] ss:$16 sps:$4 sm:$0xff]  }
 0x261   :  { %2461 = vmatpush1.bf16.msra.mxu1 %v5893_v63  ;;  %v6000_v63 = vld [vmem:[#allocation4 + $0xa84] ss:$16 sps:$4 sm:$0xff]  }
 0x262   :  { %2462 = vmatprep.subr.bf16.mxu1 %v5898_v1  ;;  %3295 = vmatpush1.bf16.msra.mxu0 %v5941_v12  ;;  %v6006_v1 = vld [vmem:[#allocation4 + $0xa64] ss:$16 sps:$4 sm:$0xff]   ;;  %v6028_v12 = vld [vmem:[#allocation4 + $0xbe0] ss:$16 sps:$4 sm:$0xff]  }
 0x263   :  { %3296 = vmatprep.subr.bf16.mxu0 %v5946_v14  ;;  %v6034_v14 = vld [vmem:[#allocation4 + $0xbc0] ss:$16 sps:$4 sm:$0xff]  }
 0x265   :  { %2463 = vmatpush1.bf16.msra.mxu1 %v5896_v7  ;;  %v6012_v7 = vld [vmem:[#allocation4 + $0xa44] ss:$16 sps:$4 sm:$0xff]  }
 0x266   :  { %2464 = vmatprep.subr.bf16.mxu1 %v5901_v10  ;;  %3297 = vmatpush1.bf16.msra.mxu0 %v5944_v16  ;;  %v6018_v10 = vld [vmem:[#allocation4 + $0xa24] ss:$16 sps:$4 sm:$0xff]   ;;  %v6040_v16 = vld [vmem:[#allocation4 + $0xba0] ss:$16 sps:$4 sm:$0xff]  }
 0x267   :  { %3298 = vmatprep.subr.bf16.mxu0 %v5949_v18  ;;  %v6046_v18 = vld [vmem:[#allocation4 + $0xb80] ss:$16 sps:$4 sm:$0xff]  }
 0x269   :  { %2465 = vmatpush1.bf16.msra.mxu1 %v5899_v9  ;;  %v6024_v9 = vld [vmem:[#allocation4 + $0xa04] ss:$16 sps:$4 sm:$0xff]  }
 0x26a   :  { %2466 = vmatprep.subr.bf16.mxu1 %v5904_v13  ;;  %3299 = vmatpush1.bf16.msra.mxu0 %v5947_v20  ;;  %v6030_v13 = vld [vmem:[#allocation4 + $0xbe4] ss:$16 sps:$4 sm:$0xff]   ;;  %v6052_v20 = vld [vmem:[#allocation4 + $0xb60] ss:$16 sps:$4 sm:$0xff]  }
 0x26b   :  { %3300 = vmatprep.subr.bf16.mxu0 %v5952_v22  ;;  %v6058_v22 = vld [vmem:[#allocation4 + $0xb40] ss:$16 sps:$4 sm:$0xff]  }
 0x26d   :  { %2467 = vmatpush1.bf16.msra.mxu1 %v5902_v15  ;;  %v6036_v15 = vld [vmem:[#allocation4 + $0xbc4] ss:$16 sps:$4 sm:$0xff]  }
 0x26e   :  { %2468 = vmatprep.subr.bf16.mxu1 %v5907_v17  ;;  %3301 = vmatpush1.bf16.msra.mxu0 %v5950_v24  ;;  %v6042_v17 = vld [vmem:[#allocation4 + $0xba4] ss:$16 sps:$4 sm:$0xff]  }
 0x26f   :  { %3302 = vmatprep.subr.bf16.mxu0 %v5955_v26  ;;  %v6066_v24 = vld [vmem:[#allocation4 + $0xb24] ss:$16 sps:$4 sm:$0xff]   ;;  %v6064_v26 = vld [vmem:[#allocation4 + $0xb20] ss:$16 sps:$4 sm:$0xff]  }
 0x271   :  { %2469 = vmatpush1.bf16.msra.mxu1 %v5905_v19  ;;  %v6048_v19 = vld [vmem:[#allocation4 + $0xb84] ss:$16 sps:$4 sm:$0xff]  }
 0x272   :  { %2470 = vmatprep.subr.bf16.mxu1 %v5910_v21  ;;  %3303 = vmatpush1.bf16.msra.mxu0 %v5953_v28  ;;  %v6054_v21 = vld [vmem:[#allocation4 + $0xb64] ss:$16 sps:$4 sm:$0xff]  }
 0x273   :  { %3304 = vmatprep.subr.bf16.mxu0 %v5958_v30  ;;  %v6072_v28 = vld [vmem:[#allocation4 + $0xb04] ss:$16 sps:$4 sm:$0xff]   ;;  %v6070_v30 = vld [vmem:[#allocation4 + $0xb00] ss:$16 sps:$4 sm:$0xff]  }
 0x275   :  { %2471 = vmatpush2.bf16.msra.mxu1 %v5908_v23  ;;  %v6060_v23 = vld [vmem:[#allocation4 + $0xb44] ss:$16 sps:$4 sm:$0xff]  }
 0x276   :  { %2472 = vmatprep.subr.bf16.mxu1 %v5913_v25  ;;  %3305 = vmatpush2.bf16.msra.mxu0 %v5956_v33  ;;  %v6078_v33 = vld [vmem:[#allocation4 + $0xaec] ss:$16 sps:$4 sm:$0xff]  }
 0x277   :  { %3306 = vmatprep.subr.bf16.mxu0 %v5961_v35  ;;  %v6574_v35 = vld [vmem:[#allocation6] sm:$0x1f] }
 0x279   :  { %2473 = vmatpush2.bf16.msra.mxu1 %v5911_v27 }
 0x27a   :  { %2474 = vmatprep.subr.bf16.mxu1 %v5916_v29  ;;  %3307 = vmatpush2.bf16.msra.mxu0 %v5959_v37  ;;  %v6578_v37 = vld [vmem:[#allocation6 + $0x8] sm:$0x1f] }
 0x27b   :  { %3308 = vmatprep.subr.bf16.mxu0 %v5964_v40 }
 0x27d   :  { %2475 = vmatpush2.bf16.msra.mxu1 %v5914_v31 }
 0x27e   :  { %2476 = vmatprep.subr.bf16.mxu1 %v5919_v34  ;;  %3309 = vmatpush2.bf16.msra.mxu0 %v5962_v42  ;;  %v6572_v34 = vsub.s32 2, %v6529_v6 }
 0x27f   :  { %3310 = vmatprep.subr.bf16.mxu0 %v5967_v44 }
 0x281   :  { %2477 = vmatpush2.bf16.msra.mxu1 %v5917_v36  ;;  %v1678_v36 = vrot.slane %v6574_v35, %v6572_v34 }
 0x282   :  { %2478 = vmatprep.subr.bf16.mxu1 %v5922_v38  ;;  %3311 = vmatpush2.bf16.msra.mxu0 %v5965_v46  ;;  %v1682_v38 = vrot.slane %v6578_v37, %v6572_v34 }
 0x283   :  { %3312 = vmatprep.subr.bf16.mxu0 %v5970_v48 }
 0x285   :  { %2479 = vmatpush2.bf16.msra.mxu1 %v5920_v41 }
 0x286   :  { %2480 = vmatprep.subr.bf16.mxu1 %v5925_v43  ;;  %3313 = vmatpush2.bf16.msra.mxu0 %v5968_v8 }
 0x287   :  { %3314 = vmatprep.subr.bf16.mxu0 %v5973_v52 }
 0x289   :  { %2481 = vmatpush2.bf16.msra.mxu1 %v5923_v45 }
 0x28a   :  { %2482 = vmatprep.subr.bf16.mxu1 %v5928_v47  ;;  %3315 = vmatpush2.bf16.msra.mxu0 %v5971_v53 }
 0x28b   :  { %3316 = vmatprep.subr.bf16.mxu0 %v5976_v11  ;;  %v5983_v11 = vld [vmem:[#allocation4 + $0x8e8] ss:$16 sps:$4 sm:$0xff]  }
 0x28d   :  { %2483 = vmatpush2.bf16.msra.mxu1 %v5926_v49 }
 0x28e   :  { %2484 = vmatprep.subr.bf16.mxu1 %v5931_v51  ;;  %3317 = vmatpush2.bf16.msra.mxu0 %v5974_v50 }
 0x28f   :  { %3318 = vmatprep.subr.bf16.mxu0 %v5979_v32  ;;  %v5991_v32 = vld [vmem:[#allocation4 + $0x8cc] ss:$16 sps:$4 sm:$0xff]  }
 0x291   :  { %2485 = vmatpush2.bf16.msra.mxu1 %v5929_v39 }
 0x292   :  { %3319 = vmatpush2.bf16.msra.mxu0 %v5977_v55  ;;  %3329 = vmatprep.subr.bf16.mxu1 %v5982_v57  ;;  %v5989_v55 = vld [vmem:[#allocation4 + $0x8c8] ss:$16 sps:$4 sm:$0xff]  }
 0x293   :  { %3370 = vmatprep.subr.bf16.mxu0 %v5985_v58  ;;  %v5995_v57 = vld [vmem:[#allocation4 + $0x8a8] ss:$16 sps:$4 sm:$0xff]   ;;  %v6003_v58 = vld [vmem:[#allocation4 + $0x88c] ss:$16 sps:$4 sm:$0xff]  }
 0x294   :  { %2487 = vmatmul.mubr.bf16.vlgmr.msra.gmra.mxu1 %v6566_v54  ;;  %v5994_v54 = vld [vmem:[#allocation4 + $0xaa4] ss:$16 sps:$4 sm:$0xff]  }
 0x295   :  { %3330 = vmatpush1.bf16.msra.mxu1 %v5980_v56  ;;  %v5997_v56 = vld [vmem:[#allocation4 + $0x8ac] ss:$16 sps:$4 sm:$0xff]  }
 0x296   :  { %3331 = vmatprep.subr.bf16.mxu1 %v5988_v60  ;;  %v6009_v60 = vld [vmem:[#allocation4 + $0x86c] ss:$16 sps:$4 sm:$0xff]  }
 0x299   :  { %3332 = vmatpush1.bf16.msra.mxu1 %v5986_v59  ;;  %v6001_v59 = vld [vmem:[#allocation4 + $0x888] ss:$16 sps:$4 sm:$0xff]  }
 0x29a   :  { %3333 = vmatprep.subr.bf16.mxu1 %v5994_v54  ;;  %v6015_v54 = vld [vmem:[#allocation4 + $0x84c] ss:$16 sps:$4 sm:$0xff]  }
 0x29d   :  { %3334 = vmatpush1.bf16.msra.mxu1 %v5992_v61  ;;  %v6007_v61 = vld [vmem:[#allocation4 + $0x868] ss:$16 sps:$4 sm:$0xff]  }
 0x29e   :  { %3335 = vmatprep.subr.bf16.mxu1 %v6000_v63  ;;  %v6021_v63 = vld [vmem:[#allocation4 + $0x82c] ss:$16 sps:$4 sm:$0xff]  }
 0x2a1   :  { %3336 = vmatpush1.bf16.msra.mxu1 %v5998_v62  ;;  %v6013_v62 = vld [vmem:[#allocation4 + $0x848] ss:$16 sps:$4 sm:$0xff]  }
 0x2a2   :  { %3337 = vmatprep.subr.bf16.mxu1 %v6006_v1  ;;  %v6027_v1 = vld [vmem:[#allocation4 + $0x80c] ss:$16 sps:$4 sm:$0xff]  }
 0x2a5   :  { %3338 = vmatpush1.bf16.msra.mxu1 %v6004_v0  ;;  %v6019_v0 = vld [vmem:[#allocation4 + $0x828] ss:$16 sps:$4 sm:$0xff]  }
 0x2a6   :  { %3339 = vmatprep.subr.bf16.mxu1 %v6012_v7  ;;  %v6033_v7 = vld [vmem:[#allocation4 + $0x9ec] ss:$16 sps:$4 sm:$0xff]  }
 0x2a9   :  { %3340 = vmatpush1.bf16.msra.mxu1 %v6010_v2  ;;  %v6025_v2 = vld [vmem:[#allocation4 + $0x808] ss:$16 sps:$4 sm:$0xff]  }
 0x2aa   :  { %3341 = vmatprep.subr.bf16.mxu1 %v6018_v10  ;;  %v6039_v10 = vld [vmem:[#allocation4 + $0x9cc] ss:$16 sps:$4 sm:$0xff]  }
 0x2ad   :  { %3342 = vmatpush1.bf16.msra.mxu1 %v6016_v3  ;;  %v6031_v3 = vld [vmem:[#allocation4 + $0x9e8] ss:$16 sps:$4 sm:$0xff]  }
 0x2ae   :  { %3343 = vmatprep.subr.bf16.mxu1 %v6024_v9  ;;  %v6045_v9 = vld [vmem:[#allocation4 + $0x9ac] ss:$16 sps:$4 sm:$0xff]  }
 0x2b1   :  { %3344 = vmatpush1.bf16.msra.mxu1 %v6022_v4  ;;  %v6037_v4 = vld [vmem:[#allocation4 + $0x9c8] ss:$16 sps:$4 sm:$0xff]  }
 0x2b2   :  { %3345 = vmatprep.subr.bf16.mxu1 %v6030_v13  ;;  %v6051_v13 = vld [vmem:[#allocation4 + $0x98c] ss:$16 sps:$4 sm:$0xff]  }
 0x2b5   :  { %3346 = vmatpush2.bf16.msra.mxu1 %v6028_v12  ;;  %v6043_v12 = vld [vmem:[#allocation4 + $0x9a8] ss:$16 sps:$4 sm:$0xff]  }
 0x2b6   :  { %3347 = vmatprep.subr.bf16.mxu1 %v6036_v15  ;;  %v6057_v15 = vld [vmem:[#allocation4 + $0x96c] ss:$16 sps:$4 sm:$0xff]  }
 0x2b9   :  { %3348 = vmatpush2.bf16.msra.mxu1 %v6034_v14  ;;  %v6049_v14 = vld [vmem:[#allocation4 + $0x988] ss:$16 sps:$4 sm:$0xff]  }
 0x2ba   :  { %3349 = vmatprep.subr.bf16.mxu1 %v6042_v17  ;;  %v6063_v17 = vld [vmem:[#allocation4 + $0x94c] ss:$16 sps:$4 sm:$0xff]  }
 0x2bd   :  { %3350 = vmatpush2.bf16.msra.mxu1 %v6040_v16  ;;  %v6055_v16 = vld [vmem:[#allocation4 + $0x968] ss:$16 sps:$4 sm:$0xff]  }
 0x2be   :  { %3351 = vmatprep.subr.bf16.mxu1 %v6048_v19 }
 0x2c1   :  { %3352 = vmatpush2.bf16.msra.mxu1 %v6046_v18  ;;  %v6589_v18 = vld [vmem:[#allocation6 + $0x10] sm:$0x1f] }
 0x2c2   :  { %3353 = vmatprep.subr.bf16.mxu1 %v6054_v21  ;;  %v1686_v19 = vrot.slane %v6589_v18, %v6572_v34  ;;  %v6069_v21 = vld [vmem:[#allocation4 + $0x92c] ss:$16 sps:$4 sm:$0xff]  }
 0x2c5   :  { %3354 = vmatpush2.bf16.msra.mxu1 %v6052_v20  ;;  %v6061_v20 = vld [vmem:[#allocation4 + $0x948] ss:$16 sps:$4 sm:$0xff]  }
 0x2c6   :  { %3355 = vmatprep.subr.bf16.mxu1 %v6060_v23 }
 0x2c9   :  { %3356 = vmatpush2.bf16.msra.mxu1 %v6058_v22  ;;  %v6593_v22 = vld [vmem:[#allocation6 + $0x18] sm:$0x1f] }
 0x2ca   :  { %3357 = vmatprep.subr.bf16.mxu1 %v6066_v24  ;;  %v1690_v23 = vrot.slane %v6593_v22, %v6572_v34 }
 0x2cd   :  { %3358 = vmatpush2.bf16.msra.mxu1 %v6064_v26 }
 0x2ce   :  { %3359 = vmatprep.subr.bf16.mxu1 %v6072_v28 }
 0x2d1   :  { %3360 = vmatpush2.bf16.msra.mxu1 %v6070_v30 }
 0x2d2   :  { %3411 = vmatprep.subr.bf16.mxu1 %v6078_v33  ;;  %v6073_v33 = vld [vmem:[#allocation4 + $0x908] ss:$16 sps:$4 sm:$0xff]  }
 0x2d4   :  { %v2365_v25 = vpop.f32.mrf.mxu0 }
 0x2d5   :  { %v2366_v40 = vadd.f32 %v2365_v25, %v1678_v36  ;;  %v6067_v25 = vld [vmem:[#allocation4 + $0x928] ss:$16 sps:$4 sm:$0xff]  }
 0x2d6   :  { %v2367_v27 = vpop.f32.mrf.mxu0 }
 0x2d7   :  { %v2368_v43 = vadd.f32 %v2367_v27, %v1682_v38  ;;  %v6075_v27 = vld [vmem:[#allocation4 + $0x90c] ss:$16 sps:$4 sm:$0xff]  }
 0x2d8   :  { %v2369_v29 = vpop.f32.mrf.mxu0 }
 0x2da   :  { %v2370_v31 = vpop.f32.mrf.mxu0 }
 0x314   :  { %v2406_v41 = vpop.f32.mrf.mxu1  ;;  %v6582_v42 = vpop.f32.mrf.mxu0 }
 0x315   :  { %v2407_v44 = vadd.f32 %v2406_v41, %v2366_v40  ;;  %v2448_v24 = vadd.f32 %v6582_v42, %v1686_v19  ;;  %v6076_v42 = vld [vmem:[#allocation4 + $0xae8] ss:$16 sps:$4 sm:$0xff]   ;;  %v6111_v19 = vld [vmem:[#allocation4 + $0xb8c] ss:$16 sps:$4 sm:$0xff]  }
 0x316   :  { %v2408_v45 = vpop.f32.mrf.mxu1  ;;  %v6584_v46 = vpop.f32.mrf.mxu0 }
 0x317   :  { %v2409_v47 = vadd.f32 %v2408_v45, %v2368_v43  ;;  %v2495_v48 = vmax.f32 %v2407_v44, 0.0  ;;  %v2450_v28 = vadd.f32 %v6584_v46, %v1690_v23  ;;  %v6081_v44 = vld [vmem:[#allocation4 + $0xacc] ss:$16 sps:$4 sm:$0xff]   ;;  %v6079_v45 = vld [vmem:[#allocation4 + $0xac8] ss:$16 sps:$4 sm:$0xff]  }
 0x318   :  { %v2410_v49 = vpop.f32.mrf.mxu1  ;;  %v2451_v8 = vpop.f32.mrf.mxu0  ;;  %v6084_v46 = vld [vmem:[#allocation4 + $0xaac] ss:$16 sps:$4 sm:$0xff]   ;;  %v6151_v23 = vld [vmem:[#allocation4 + $0xdc0] ss:$16 sps:$4 sm:$0xff]  }
 0x319   :  { %v2496_v51 = vmax.f32 %v2409_v47, 0.0  ;;  %v6586_v50 = vpack.c.bf16 %v2495_v48, %v2495_v48  ;;  %v6082_v47 = vld [vmem:[#allocation4 + $0xaa8] ss:$16 sps:$4 sm:$0xff]   ;;  %v6087_v48 = vld [vmem:[#allocation4 + $0xa8c] ss:$16 sps:$4 sm:$0xff]  }
 0x31a   :  { %v2411_v52 = vpop.f32.mrf.mxu1  ;;  %v2452_v39 = vpop.f32.mrf.mxu0  ;;  %v6124_v49 = vld [vmem:[#allocation4 + $0xce0] ss:$16 sps:$4 sm:$0xff]   ;;  %v6126_v8 = vld [vmem:[#allocation4 + $0xce4] ss:$16 sps:$4 sm:$0xff]  }
 0x31b   :  { %v2500_v53 = vpack.c.bf16 %v2496_v51, %v2496_v51  ;;  %v6129_v51 = vld [vmem:[#allocation4 + $0xcc4] ss:$16 sps:$4 sm:$0xff]   ;;  %v6085_v52 = vld [vmem:[#allocation4 + $0xa88] ss:$16 sps:$4 sm:$0xff]   ;;  %v6127_v39 = vld [vmem:[#allocation4 + $0xcc0] ss:$16 sps:$4 sm:$0xff]  }
 0x31d   :  { %3320 = vmatprep.mubr.bf16.mxu0 %v2500_v53 }
 0x31e   :  { %3321 = vmatmul.mubr.bf16.vlgmr.msra.gmra.mxu0 %v6586_v50 }
 0x31f   :  { %3371 = vmatpush1.bf16.msra.mxu0 %v5983_v11  ;;  %3402 = vmatprep.mubr.bf16.mxu0 %v2500_v53  ;;  %v6090_v53 = vld [vmem:[#allocation4 + $0xa6c] ss:$16 sps:$4 sm:$0xff]   ;;  %v6132_v11 = vld [vmem:[#allocation4 + $0xca4] ss:$16 sps:$4 sm:$0xff]  }
 0x320   :  { %3372 = vmatprep.subr.bf16.mxu0 %v5991_v32  ;;  %v6130_v32 = vld [vmem:[#allocation4 + $0xca0] ss:$16 sps:$4 sm:$0xff]  }
 0x323   :  { %3373 = vmatpush1.bf16.msra.mxu0 %v5989_v55  ;;  %v6093_v55 = vld [vmem:[#allocation4 + $0xa4c] ss:$16 sps:$4 sm:$0xff]  }
 0x324   :  { %3374 = vmatprep.subr.bf16.mxu0 %v5997_v56  ;;  %v6135_v56 = vld [vmem:[#allocation4 + $0xc84] ss:$16 sps:$4 sm:$0xff]  }
 0x327   :  { %3375 = vmatpush1.bf16.msra.mxu0 %v5995_v57  ;;  %v6091_v57 = vld [vmem:[#allocation4 + $0xa48] ss:$16 sps:$4 sm:$0xff]  }
 0x328   :  { %3376 = vmatprep.subr.bf16.mxu0 %v6003_v58  ;;  %v6133_v58 = vld [vmem:[#allocation4 + $0xc80] ss:$16 sps:$4 sm:$0xff]  }
 0x32b   :  { %3377 = vmatpush1.bf16.msra.mxu0 %v6001_v59  ;;  %v6096_v59 = vld [vmem:[#allocation4 + $0xa2c] ss:$16 sps:$4 sm:$0xff]  }
 0x32c   :  { %3378 = vmatprep.subr.bf16.mxu0 %v6009_v60  ;;  %v6138_v60 = vld [vmem:[#allocation4 + $0xc64] ss:$16 sps:$4 sm:$0xff]  }
 0x32f   :  { %3379 = vmatpush1.bf16.msra.mxu0 %v6007_v61  ;;  %v6094_v61 = vld [vmem:[#allocation4 + $0xa28] ss:$16 sps:$4 sm:$0xff]  }
 0x330   :  { %3380 = vmatprep.subr.bf16.mxu0 %v6015_v54  ;;  %v6136_v54 = vld [vmem:[#allocation4 + $0xc60] ss:$16 sps:$4 sm:$0xff]  }
 0x333   :  { %3381 = vmatpush1.bf16.msra.mxu0 %v6013_v62  ;;  %v6099_v62 = vld [vmem:[#allocation4 + $0xa0c] ss:$16 sps:$4 sm:$0xff]  }
 0x334   :  { %3382 = vmatprep.subr.bf16.mxu0 %v6021_v63  ;;  %v6141_v63 = vld [vmem:[#allocation4 + $0xc44] ss:$16 sps:$4 sm:$0xff]  }
 0x337   :  { %3383 = vmatpush1.bf16.msra.mxu0 %v6019_v0  ;;  %v6097_v0 = vld [vmem:[#allocation4 + $0xa08] ss:$16 sps:$4 sm:$0xff]  }
 0x338   :  { %3384 = vmatprep.subr.bf16.mxu0 %v6027_v1  ;;  %v6139_v1 = vld [vmem:[#allocation4 + $0xc40] ss:$16 sps:$4 sm:$0xff]  }
 0x33b   :  { %3385 = vmatpush1.bf16.msra.mxu0 %v6025_v2  ;;  %v6102_v2 = vld [vmem:[#allocation4 + $0xbec] ss:$16 sps:$4 sm:$0xff]  }
 0x33c   :  { %3386 = vmatprep.subr.bf16.mxu0 %v6033_v7  ;;  %v6144_v7 = vld [vmem:[#allocation4 + $0xc24] ss:$16 sps:$4 sm:$0xff]  }
 0x33f   :  { %3387 = vmatpush2.bf16.msra.mxu0 %v6031_v3  ;;  %v6100_v3 = vld [vmem:[#allocation4 + $0xbe8] ss:$16 sps:$4 sm:$0xff]  }
 0x340   :  { %3388 = vmatprep.subr.bf16.mxu0 %v6039_v10  ;;  %v6142_v10 = vld [vmem:[#allocation4 + $0xc20] ss:$16 sps:$4 sm:$0xff]  }
 0x343   :  { %3389 = vmatpush2.bf16.msra.mxu0 %v6037_v4  ;;  %v6105_v4 = vld [vmem:[#allocation4 + $0xbcc] ss:$16 sps:$4 sm:$0xff]  }
 0x344   :  { %3390 = vmatprep.subr.bf16.mxu0 %v6045_v9  ;;  %v6147_v9 = vld [vmem:[#allocation4 + $0xc04] ss:$16 sps:$4 sm:$0xff]  }
 0x347   :  { %3391 = vmatpush2.bf16.msra.mxu0 %v6043_v12  ;;  %v6103_v12 = vld [vmem:[#allocation4 + $0xbc8] ss:$16 sps:$4 sm:$0xff]  }
 0x348   :  { %3392 = vmatprep.subr.bf16.mxu0 %v6051_v13  ;;  %v6145_v13 = vld [vmem:[#allocation4 + $0xc00] ss:$16 sps:$4 sm:$0xff]  }
 0x34b   :  { %3393 = vmatpush2.bf16.msra.mxu0 %v6049_v14  ;;  %v6108_v14 = vld [vmem:[#allocation4 + $0xbac] ss:$16 sps:$4 sm:$0xff]  }
 0x34c   :  { %3394 = vmatprep.subr.bf16.mxu0 %v6057_v15  ;;  %v6150_v15 = vld [vmem:[#allocation4 + $0xde4] ss:$16 sps:$4 sm:$0xff]  }
 0x34f   :  { %3395 = vmatpush2.bf16.msra.mxu0 %v6055_v16  ;;  %v6106_v16 = vld [vmem:[#allocation4 + $0xba8] ss:$16 sps:$4 sm:$0xff]  }
 0x350   :  { %3396 = vmatprep.subr.bf16.mxu0 %v6063_v17  ;;  %v6148_v17 = vld [vmem:[#allocation4 + $0xde0] ss:$16 sps:$4 sm:$0xff]  }
 0x353   :  { %3397 = vmatpush2.bf16.msra.mxu0 %v6061_v20  ;;  %v6153_v20 = vld [vmem:[#allocation4 + $0xdc4] ss:$16 sps:$4 sm:$0xff]  }
 0x354   :  { %v2488_v26 = vpop.f32.mrf.mxu1  ;;  %3398 = vmatprep.subr.bf16.mxu0 %v6069_v21  ;;  %v6109_v21 = vld [vmem:[#allocation4 + $0xb88] ss:$16 sps:$4 sm:$0xff]  }
 0x355   :  { %v2489_v29 = vadd.f32 %v2488_v26, %v2448_v24  ;;  %v6114_v24 = vld [vmem:[#allocation4 + $0xb6c] ss:$16 sps:$4 sm:$0xff]   ;;  %v6112_v26 = vld [vmem:[#allocation4 + $0xb68] ss:$16 sps:$4 sm:$0xff]  }
 0x356   :  { %v2490_v30 = vpop.f32.mrf.mxu1 }
 0x357   :  { %v2491_v31 = vadd.f32 %v2490_v30, %v2450_v28  ;;  %3399 = vmatpush2.bf16.msra.mxu0 %v6067_v25  ;;  %v2497_v36 = vmax.f32 %v2489_v29, 0.0  ;;  %v6156_v25 = vld [vmem:[#allocation4 + $0xda4] ss:$16 sps:$4 sm:$0xff]   ;;  %v6117_v28 = vld [vmem:[#allocation4 + $0xb4c] ss:$16 sps:$4 sm:$0xff]  }
 0x358   :  { %v2492_v38 = vpop.f32.mrf.mxu1  ;;  %3400 = vmatprep.subr.bf16.mxu0 %v6075_v27  ;;  %v6154_v27 = vld [vmem:[#allocation4 + $0xda0] ss:$16 sps:$4 sm:$0xff]   ;;  %v6159_v29 = vld [vmem:[#allocation4 + $0xd84] ss:$16 sps:$4 sm:$0xff]   ;;  %v6115_v30 = vld [vmem:[#allocation4 + $0xb48] ss:$16 sps:$4 sm:$0xff]  }
 0x359   :  { %v2498_v40 = vmax.f32 %v2491_v31, 0.0  ;;  %v6599_v43 = vpack.c.bf16 %v2497_v36, %v2497_v36  ;;  %v6157_v31 = vld [vmem:[#allocation4 + $0xd80] ss:$16 sps:$4 sm:$0xff]   ;;  %v6162_v36 = vld [vmem:[#allocation4 + $0xd64] ss:$16 sps:$4 sm:$0xff]  }
 0x35a   :  { %v2493_v41 = vpop.f32.mrf.mxu1  ;;  %v6118_v38 = vld [vmem:[#allocation4 + $0xb28] ss:$16 sps:$4 sm:$0xff]  }
 0x35b   :  { %v2502_v34 = vpack.c.bf16 %v2498_v40, %v2498_v40  ;;  %3401 = vmatpush2.bf16.msra.mxu0 %v6073_v33  ;;  %v6120_v33 = vld [vmem:[#allocation4 + $0xb2c] ss:$16 sps:$4 sm:$0xff]   ;;  %v6160_v40 = vld [vmem:[#allocation4 + $0xd60] ss:$16 sps:$4 sm:$0xff]  }
 0x35c   :  { %4245 = vmatprep.subr.bf16.mxu0 %v6126_v8  ;;  %v6123_v41 = vld [vmem:[#allocation4 + $0xb0c] ss:$16 sps:$4 sm:$0xff]   ;;  %v6174_v8 = vld [vmem:[#allocation4 + $0xee4] ss:$16 sps:$4 sm:$0xff]  }
 0x35d   :  { %3361 = vmatprep.mubr.bf16.mxu1 %v2502_v34 }
 0x35e   :  { %3362 = vmatmul.mubr.bf16.vlgmr.msra.gmra.mxu1 %v6599_v43  ;;  %3403 = vmatmul.mubr.bf16.vlgmr.msra.gmra.mxu0 %v6586_v50  ;;  %v6088_v50 = vld [vmem:[#allocation4 + $0xa68] ss:$16 sps:$4 sm:$0xff]  }
 0x35f   :  { %3412 = vmatpush1.bf16.msra.mxu1 %v6076_v42  ;;  %3443 = vmatprep.mubr.bf16.mxu1 %v2502_v34  ;;  %v6165_v34 = vld [vmem:[#allocation4 + $0xd44] ss:$16 sps:$4 sm:$0xff]   ;;  %v6121_v42 = vld [vmem:[#allocation4 + $0xb08] ss:$16 sps:$4 sm:$0xff]  }
 0x360   :  { %3413 = vmatprep.subr.bf16.mxu1 %v6081_v44  ;;  %4246 = vmatpush1.bf16.msra.mxu0 %v6124_v49  ;;  %v6163_v44 = vld [vmem:[#allocation4 + $0xd40] ss:$16 sps:$4 sm:$0xff]  }
 0x361   :  { %4247 = vmatprep.subr.bf16.mxu0 %v6129_v51  ;;  %v6172_v49 = vld [vmem:[#allocation4 + $0xee0] ss:$16 sps:$4 sm:$0xff]   ;;  %v6177_v51 = vld [vmem:[#allocation4 + $0xcec] ss:$16 sps:$4 sm:$0xff]  }
 0x363   :  { %3414 = vmatpush1.bf16.msra.mxu1 %v6079_v45  ;;  %v6168_v45 = vld [vmem:[#allocation4 + $0xd24] ss:$16 sps:$4 sm:$0xff]  }
 0x364   :  { %3415 = vmatprep.subr.bf16.mxu1 %v6084_v46  ;;  %4248 = vmatpush1.bf16.msra.mxu0 %v6127_v39  ;;  %v6166_v46 = vld [vmem:[#allocation4 + $0xd20] ss:$16 sps:$4 sm:$0xff]   ;;  %v6180_v39 = vld [vmem:[#allocation4 + $0xec4] ss:$16 sps:$4 sm:$0xff]  }
 0x365   :  { %4249 = vmatprep.subr.bf16.mxu0 %v6132_v11  ;;  %v6190_v11 = vld [vmem:[#allocation4 + $0xe80] ss:$16 sps:$4 sm:$0xff]  }
 0x367   :  { %3416 = vmatpush1.bf16.msra.mxu1 %v6082_v47  ;;  %v6171_v47 = vld [vmem:[#allocation4 + $0xd04] ss:$16 sps:$4 sm:$0xff]  }
 0x368   :  { %3417 = vmatprep.subr.bf16.mxu1 %v6087_v48  ;;  %4250 = vmatpush1.bf16.msra.mxu0 %v6130_v32  ;;  %v6169_v48 = vld [vmem:[#allocation4 + $0xd00] ss:$16 sps:$4 sm:$0xff]  }
 0x369   :  { %4251 = vmatprep.subr.bf16.mxu0 %v6135_v56  ;;  %v6196_v32 = vld [vmem:[#allocation4 + $0xe60] ss:$16 sps:$4 sm:$0xff]  }
 0x36a   :  { %v6202_v56 = vld [vmem:[#allocation4 + $0xe40] ss:$16 sps:$4 sm:$0xff]  }
 0x36b   :  { %3418 = vmatpush1.bf16.msra.mxu1 %v6085_v52  ;;  %v6178_v52 = vld [vmem:[#allocation4 + $0xec0] ss:$16 sps:$4 sm:$0xff]  }
 0x36c   :  { %3419 = vmatprep.subr.bf16.mxu1 %v6090_v53  ;;  %4252 = vmatpush1.bf16.msra.mxu0 %v6133_v58  ;;  %v6184_v53 = vld [vmem:[#allocation4 + $0xea0] ss:$16 sps:$4 sm:$0xff]  }
 0x36d   :  { %4253 = vmatprep.subr.bf16.mxu0 %v6138_v60  ;;  %v6208_v58 = vld [vmem:[#allocation4 + $0xe20] ss:$16 sps:$4 sm:$0xff]  }
 0x36e   :  { %v6214_v60 = vld [vmem:[#allocation4 + $0xe00] ss:$16 sps:$4 sm:$0xff]  }
 0x36f   :  { %3420 = vmatpush1.bf16.msra.mxu1 %v6088_v50  ;;  %v6192_v50 = vld [vmem:[#allocation4 + $0xe84] ss:$16 sps:$4 sm:$0xff]  }
 0x370   :  { %3421 = vmatprep.subr.bf16.mxu1 %v6093_v55  ;;  %4254 = vmatpush1.bf16.msra.mxu0 %v6136_v54  ;;  %v6198_v55 = vld [vmem:[#allocation4 + $0xe64] ss:$16 sps:$4 sm:$0xff]   ;;  %v6220_v54 = vld [vmem:[#allocation4 + $0xfe0] ss:$16 sps:$4 sm:$0xff]  }
 0x371   :  { %4255 = vmatprep.subr.bf16.mxu0 %v6141_v63  ;;  %v6226_v63 = vld [vmem:[#allocation4 + $0xfc0] ss:$16 sps:$4 sm:$0xff]  }
 0x373   :  { %3422 = vmatpush1.bf16.msra.mxu1 %v6091_v57  ;;  %v6204_v57 = vld [vmem:[#allocation4 + $0xe44] ss:$16 sps:$4 sm:$0xff]  }
 0x374   :  { %3423 = vmatprep.subr.bf16.mxu1 %v6096_v59  ;;  %4256 = vmatpush1.bf16.msra.mxu0 %v6139_v1  ;;  %v6210_v59 = vld [vmem:[#allocation4 + $0xe24] ss:$16 sps:$4 sm:$0xff]   ;;  %v6232_v1 = vld [vmem:[#allocation4 + $0xfa0] ss:$16 sps:$4 sm:$0xff]  }
 0x375   :  { %4257 = vmatprep.subr.bf16.mxu0 %v6144_v7  ;;  %v6238_v7 = vld [vmem:[#allocation4 + $0xf80] ss:$16 sps:$4 sm:$0xff]  }
 0x377   :  { %3424 = vmatpush1.bf16.msra.mxu1 %v6094_v61  ;;  %v6216_v61 = vld [vmem:[#allocation4 + $0xe04] ss:$16 sps:$4 sm:$0xff]  }
 0x378   :  { %3425 = vmatprep.subr.bf16.mxu1 %v6099_v62  ;;  %4258 = vmatpush1.bf16.msra.mxu0 %v6142_v10  ;;  %v6222_v62 = vld [vmem:[#allocation4 + $0xfe4] ss:$16 sps:$4 sm:$0xff]   ;;  %v6244_v10 = vld [vmem:[#allocation4 + $0xf60] ss:$16 sps:$4 sm:$0xff]  }
 0x379   :  { %4259 = vmatprep.subr.bf16.mxu0 %v6147_v9  ;;  %v6250_v9 = vld [vmem:[#allocation4 + $0xf40] ss:$16 sps:$4 sm:$0xff]  }
 0x37b   :  { %3426 = vmatpush1.bf16.msra.mxu1 %v6097_v0  ;;  %v6228_v0 = vld [vmem:[#allocation4 + $0xfc4] ss:$16 sps:$4 sm:$0xff]  }
 0x37c   :  { %3427 = vmatprep.subr.bf16.mxu1 %v6102_v2  ;;  %4260 = vmatpush1.bf16.msra.mxu0 %v6145_v13  ;;  %v6234_v2 = vld [vmem:[#allocation4 + $0xfa4] ss:$16 sps:$4 sm:$0xff]  }
 0x37d   :  { %4261 = vmatprep.subr.bf16.mxu0 %v6150_v15  ;;  %v6258_v13 = vld [vmem:[#allocation4 + $0xf24] ss:$16 sps:$4 sm:$0xff]   ;;  %v6256_v15 = vld [vmem:[#allocation4 + $0xf20] ss:$16 sps:$4 sm:$0xff]  }
 0x37f   :  { %3428 = vmatpush2.bf16.msra.mxu1 %v6100_v3  ;;  %v6240_v3 = vld [vmem:[#allocation4 + $0xf84] ss:$16 sps:$4 sm:$0xff]  }
 0x380   :  { %3429 = vmatprep.subr.bf16.mxu1 %v6105_v4  ;;  %4262 = vmatpush2.bf16.msra.mxu0 %v6148_v17  ;;  %v6246_v4 = vld [vmem:[#allocation4 + $0xf64] ss:$16 sps:$4 sm:$0xff]  }
 0x381   :  { %4263 = vmatprep.subr.bf16.mxu0 %v6153_v20  ;;  %v6264_v17 = vld [vmem:[#allocation4 + $0xf04] ss:$16 sps:$4 sm:$0xff]   ;;  %v6262_v20 = vld [vmem:[#allocation4 + $0xf00] ss:$16 sps:$4 sm:$0xff]  }
 0x383   :  { %3430 = vmatpush2.bf16.msra.mxu1 %v6103_v12  ;;  %v6252_v12 = vld [vmem:[#allocation4 + $0xf44] ss:$16 sps:$4 sm:$0xff]  }
 0x384   :  { %3431 = vmatprep.subr.bf16.mxu1 %v6108_v14  ;;  %4264 = vmatpush2.bf16.msra.mxu0 %v6151_v23  ;;  %v6270_v23 = vld [vmem:[#allocation4 + $0xeec] ss:$16 sps:$4 sm:$0xff]  }
 0x385   :  { %4265 = vmatprep.subr.bf16.mxu0 %v6156_v25 }
 0x387   :  { %3432 = vmatpush2.bf16.msra.mxu1 %v6106_v16 }
 0x388   :  { %3433 = vmatprep.subr.bf16.mxu1 %v6111_v19  ;;  %4266 = vmatpush2.bf16.msra.mxu0 %v6154_v27 }
 0x389   :  { %4267 = vmatprep.subr.bf16.mxu0 %v6159_v29 }
 0x38b   :  { %3434 = vmatpush2.bf16.msra.mxu1 %v6109_v21 }
 0x38c   :  { %3435 = vmatprep.subr.bf16.mxu1 %v6114_v24  ;;  %4268 = vmatpush2.bf16.msra.mxu0 %v6157_v31  ;;  %v6605_v24 = vsub.s32 3, %v6529_v6 }
 0x38d   :  { %4269 = vmatprep.subr.bf16.mxu0 %v6162_v36 }
 0x38e   :  { %v2635_v25 = vrot.slane %v6574_v35, %v6605_v24 }
 0x38f   :  { %3436 = vmatpush2.bf16.msra.mxu1 %v6112_v26  ;;  %v2639_v26 = vrot.slane %v6578_v37, %v6605_v24  ;;  %v6183_v37 = vld [vmem:[#allocation4 + $0xccc] ss:$16 sps:$4 sm:$0xff]  }
 0x390   :  { %3437 = vmatprep.subr.bf16.mxu1 %v6117_v28  ;;  %4270 = vmatpush2.bf16.msra.mxu0 %v6160_v40 }
 0x391   :  { %4271 = vmatprep.subr.bf16.mxu0 %v6165_v34 }
 0x393   :  { %3438 = vmatpush2.bf16.msra.mxu1 %v6115_v30 }
 0x394   :  { %3439 = vmatprep.subr.bf16.mxu1 %v6120_v33  ;;  %4272 = vmatpush2.bf16.msra.mxu0 %v6163_v44 }
 0x395   :  { %4273 = vmatprep.subr.bf16.mxu0 %v6168_v45 }
 0x397   :  { %3440 = vmatpush2.bf16.msra.mxu1 %v6118_v38 }
 0x398   :  { %3441 = vmatprep.subr.bf16.mxu1 %v6123_v41  ;;  %4274 = vmatpush2.bf16.msra.mxu0 %v6166_v46  ;;  %v6175_v46 = vld [vmem:[#allocation4 + $0xce8] ss:$16 sps:$4 sm:$0xff]  }
 0x399   :  { %4275 = vmatprep.subr.bf16.mxu0 %v6171_v47 }
 0x39b   :  { %3442 = vmatpush2.bf16.msra.mxu1 %v6121_v42 }
 0x39c   :  { %4276 = vmatpush2.bf16.msra.mxu0 %v6169_v48  ;;  %4286 = vmatprep.subr.bf16.mxu1 %v6174_v8  ;;  %v6181_v48 = vld [vmem:[#allocation4 + $0xcc8] ss:$16 sps:$4 sm:$0xff]  }
 0x39d   :  { %4327 = vmatprep.subr.bf16.mxu0 %v6177_v51  ;;  %v6187_v8 = vld [vmem:[#allocation4 + $0xca8] ss:$16 sps:$4 sm:$0xff]   ;;  %v6195_v51 = vld [vmem:[#allocation4 + $0xc8c] ss:$16 sps:$4 sm:$0xff]  }
 0x39e   :  { %3444 = vmatmul.mubr.bf16.vlgmr.msra.gmra.mxu1 %v6599_v43  ;;  %v6186_v43 = vld [vmem:[#allocation4 + $0xea4] ss:$16 sps:$4 sm:$0xff]  }
 0x39f   :  { %4287 = vmatpush1.bf16.msra.mxu1 %v6172_v49  ;;  %v6189_v49 = vld [vmem:[#allocation4 + $0xcac] ss:$16 sps:$4 sm:$0xff]  }
 0x3a0   :  { %4288 = vmatprep.subr.bf16.mxu1 %v6180_v39  ;;  %v6201_v39 = vld [vmem:[#allocation4 + $0xc6c] ss:$16 sps:$4 sm:$0xff]  }
 0x3a3   :  { %4289 = vmatpush1.bf16.msra.mxu1 %v6178_v52  ;;  %v6193_v52 = vld [vmem:[#allocation4 + $0xc88] ss:$16 sps:$4 sm:$0xff]  }
 0x3a4   :  { %4290 = vmatprep.subr.bf16.mxu1 %v6186_v43  ;;  %v6207_v43 = vld [vmem:[#allocation4 + $0xc4c] ss:$16 sps:$4 sm:$0xff]  }
 0x3a7   :  { %4291 = vmatpush1.bf16.msra.mxu1 %v6184_v53  ;;  %v6199_v53 = vld [vmem:[#allocation4 + $0xc68] ss:$16 sps:$4 sm:$0xff]  }
 0x3a8   :  { %4292 = vmatprep.subr.bf16.mxu1 %v6192_v50  ;;  %v6213_v50 = vld [vmem:[#allocation4 + $0xc2c] ss:$16 sps:$4 sm:$0xff]  }
 0x3ab   :  { %4293 = vmatpush1.bf16.msra.mxu1 %v6190_v11  ;;  %v6205_v11 = vld [vmem:[#allocation4 + $0xc48] ss:$16 sps:$4 sm:$0xff]  }
 0x3ac   :  { %4294 = vmatprep.subr.bf16.mxu1 %v6198_v55  ;;  %v6219_v55 = vld [vmem:[#allocation4 + $0xc0c] ss:$16 sps:$4 sm:$0xff]  }
 0x3af   :  { %4295 = vmatpush1.bf16.msra.mxu1 %v6196_v32  ;;  %v6211_v32 = vld [vmem:[#allocation4 + $0xc28] ss:$16 sps:$4 sm:$0xff]  }
 0x3b0   :  { %4296 = vmatprep.subr.bf16.mxu1 %v6204_v57  ;;  %v6225_v57 = vld [vmem:[#allocation4 + $0xdec] ss:$16 sps:$4 sm:$0xff]  }
 0x3b3   :  { %4297 = vmatpush1.bf16.msra.mxu1 %v6202_v56  ;;  %v6217_v56 = vld [vmem:[#allocation4 + $0xc08] ss:$16 sps:$4 sm:$0xff]  }
 0x3b4   :  { %4298 = vmatprep.subr.bf16.mxu1 %v6210_v59  ;;  %v6231_v59 = vld [vmem:[#allocation4 + $0xdcc] ss:$16 sps:$4 sm:$0xff]  }
 0x3b7   :  { %4299 = vmatpush1.bf16.msra.mxu1 %v6208_v58  ;;  %v6223_v58 = vld [vmem:[#allocation4 + $0xde8] ss:$16 sps:$4 sm:$0xff]  }
 0x3b8   :  { %4300 = vmatprep.subr.bf16.mxu1 %v6216_v61  ;;  %v6237_v61 = vld [vmem:[#allocation4 + $0xdac] ss:$16 sps:$4 sm:$0xff]  }
 0x3bb   :  { %4301 = vmatpush1.bf16.msra.mxu1 %v6214_v60  ;;  %v6229_v60 = vld [vmem:[#allocation4 + $0xdc8] ss:$16 sps:$4 sm:$0xff]  }
 0x3bc   :  { %4302 = vmatprep.subr.bf16.mxu1 %v6222_v62  ;;  %v6243_v62 = vld [vmem:[#allocation4 + $0xd8c] ss:$16 sps:$4 sm:$0xff]  }
 0x3bf   :  { %4303 = vmatpush2.bf16.msra.mxu1 %v6220_v54  ;;  %v6235_v54 = vld [vmem:[#allocation4 + $0xda8] ss:$16 sps:$4 sm:$0xff]  }
 0x3c0   :  { %4304 = vmatprep.subr.bf16.mxu1 %v6228_v0  ;;  %v6249_v0 = vld [vmem:[#allocation4 + $0xd6c] ss:$16 sps:$4 sm:$0xff]  }
 0x3c3   :  { %4305 = vmatpush2.bf16.msra.mxu1 %v6226_v63  ;;  %v6241_v63 = vld [vmem:[#allocation4 + $0xd88] ss:$16 sps:$4 sm:$0xff]  }
 0x3c4   :  { %4306 = vmatprep.subr.bf16.mxu1 %v6234_v2  ;;  %v6255_v2 = vld [vmem:[#allocation4 + $0xd4c] ss:$16 sps:$4 sm:$0xff]  }
 0x3c7   :  { %4307 = vmatpush2.bf16.msra.mxu1 %v6232_v1  ;;  %v6247_v1 = vld [vmem:[#allocation4 + $0xd68] ss:$16 sps:$4 sm:$0xff]  }
 0x3c8   :  { %4308 = vmatprep.subr.bf16.mxu1 %v6240_v3  ;;  %v6253_v3 = vld [vmem:[#allocation4 + $0xd48] ss:$16 sps:$4 sm:$0xff]  }
 0x3cb   :  { %4309 = vmatpush2.bf16.msra.mxu1 %v6238_v7  ;;  %v2643_v7 = vrot.slane %v6589_v18, %v6605_v24 }
 0x3cc   :  { %4310 = vmatprep.subr.bf16.mxu1 %v6246_v4  ;;  %v2647_v4 = vrot.slane %v6593_v22, %v6605_v24 }
 0x3cf   :  { %4311 = vmatpush2.bf16.msra.mxu1 %v6244_v10  ;;  %v6261_v10 = vld [vmem:[#allocation4 + $0xd2c] ss:$16 sps:$4 sm:$0xff]  }
 0x3d0   :  { %4312 = vmatprep.subr.bf16.mxu1 %v6252_v12  ;;  %v6259_v12 = vld [vmem:[#allocation4 + $0xd28] ss:$16 sps:$4 sm:$0xff]  }
 0x3d3   :  { %4313 = vmatpush2.bf16.msra.mxu1 %v6250_v9 }
 0x3d4   :  { %4314 = vmatprep.subr.bf16.mxu1 %v6258_v13 }
 0x3d7   :  { %4315 = vmatpush2.bf16.msra.mxu1 %v6256_v15 }
 0x3d8   :  { %4316 = vmatprep.subr.bf16.mxu1 %v6264_v17 }
 0x3db   :  { %4317 = vmatpush2.bf16.msra.mxu1 %v6262_v20  ;;  %v6265_v20 = vld [vmem:[#allocation4 + $0xd08] ss:$16 sps:$4 sm:$0xff]  }
 0x3dc   :  { %4368 = vmatprep.subr.bf16.mxu1 %v6270_v23 }
 0x3de   :  { %v3322_v14 = vpop.f32.mrf.mxu0 }
 0x3df   :  { %v3323_v27 = vadd.f32 %v3322_v14, %v2635_v25  ;;  %v6267_v14 = vld [vmem:[#allocation4 + $0xd0c] ss:$16 sps:$4 sm:$0xff]  }
 0x3e0   :  { %v3324_v16 = vpop.f32.mrf.mxu0 }
 0x3e1   :  { %v3325_v30 = vadd.f32 %v3324_v16, %v2639_v26 }
 0x3e2   :  { %v3326_v19 = vpop.f32.mrf.mxu0 }
 0x3e4   :  { %v3327_v21 = vpop.f32.mrf.mxu0 }
 0x41e   :  { %v3363_v28 = vpop.f32.mrf.mxu1  ;;  %v6611_v29 = vpop.f32.mrf.mxu0 }
 0x41f   :  { %v3364_v31 = vadd.f32 %v3363_v28, %v3323_v27  ;;  %v3405_v9 = vadd.f32 %v6611_v29, %v2643_v7  ;;  %v6268_v27 = vld [vmem:[#allocation4 + $0xee8] ss:$16 sps:$4 sm:$0xff]   ;;  %v6273_v29 = vld [vmem:[#allocation4 + $0xecc] ss:$16 sps:$4 sm:$0xff]  }
 0x420   :  { %v3365_v33 = vpop.f32.mrf.mxu1  ;;  %v6613_v36 = vpop.f32.mrf.mxu0  ;;  %v6315_v7 = vld [vmem:[#allocation4 + $0xf0c] ss:$16 sps:$4 sm:$0xff]  }
 0x421   :  { %v3366_v38 = vadd.f32 %v3365_v33, %v3325_v30  ;;  %v3452_v40 = vmax.f32 %v3364_v31, 0.0  ;;  %v3407_v15 = vadd.f32 %v6613_v36, %v2647_v4  ;;  %v6271_v30 = vld [vmem:[#allocation4 + $0xec8] ss:$16 sps:$4 sm:$0xff]   ;;  %v6276_v31 = vld [vmem:[#allocation4 + $0xeac] ss:$16 sps:$4 sm:$0xff]  }
 0x422   :  { %v3367_v41 = vpop.f32.mrf.mxu1  ;;  %v3408_v34 = vpop.f32.mrf.mxu0  ;;  %v6274_v33 = vld [vmem:[#allocation4 + $0xea8] ss:$16 sps:$4 sm:$0xff]   ;;  %v6279_v36 = vld [vmem:[#allocation4 + $0xe8c] ss:$16 sps:$4 sm:$0xff]  }
 0x423   :  { %v3453_v42 = vmax.f32 %v3366_v38, 0.0  ;;  %v6615_v47 = vpack.c.bf16 %v3452_v40, %v3452_v40  ;;  %v6316_v38 = vld [vmem:[#allocation7 + $0x78] sm:$0xff]   ;;  %v6318_v41 = vld [vmem:[#allocation7 + $0x70] sm:$0xff]   ;;  %v6329_v4 = vld [vmem:[#allocation7 + $0x8] sm:$0xff]  }
 0x424   :  { %v3368_v44 = vpop.f32.mrf.mxu1  ;;  %v3409_v45 = vpop.f32.mrf.mxu0  ;;  %v6317_v40 = vld [vmem:[#allocation7 + $0x38] sm:$0xff]  }
 0x425   :  { %v3457_v35 = vpack.c.bf16 %v3453_v42, %v3453_v42  ;;  %v6277_v34 = vld [vmem:[#allocation4 + $0xe88] ss:$16 sps:$4 sm:$0xff]   ;;  %v6319_v42 = vld [vmem:[#allocation7 + $0x30] sm:$0xff]   ;;  %v6282_v44 = vld [vmem:[#allocation4 + $0xe6c] ss:$16 sps:$4 sm:$0xff]  }
 0x426   :  { %v6320_v45 = vld [vmem:[#allocation7 + $0x68] sm:$0xff]  }
 0x427   :  { %4277 = vmatprep.mubr.bf16.mxu0 %v3457_v35 }
 0x428   :  { %4278 = vmatmul.mubr.bf16.vlgmr.msra.gmra.mxu0 %v6615_v47 }
 0x429   :  { %4328 = vmatpush1.bf16.msra.mxu0 %v6175_v46  ;;  %4359 = vmatprep.mubr.bf16.mxu0 %v3457_v35  ;;  %v6280_v35 = vld [vmem:[#allocation4 + $0xe68] ss:$16 sps:$4 sm:$0xff]  }
 0x42a   :  { %4329 = vmatprep.subr.bf16.mxu0 %v6183_v37  ;;  %v6321_v46 = vld [vmem:[#allocation7 + $0x28] sm:$0xff]   ;;  %v6322_v37 = vld [vmem:[#allocation7 + $0x60] sm:$0xff]  }
 0x42d   :  { %4330 = vmatpush1.bf16.msra.mxu0 %v6181_v48  ;;  %v6283_v48 = vld [vmem:[#allocation4 + $0xe48] ss:$16 sps:$4 sm:$0xff]  }
 0x42e   :  { %4331 = vmatprep.subr.bf16.mxu0 %v6189_v49  ;;  %v6323_v49 = vld [vmem:[#allocation7 + $0x20] sm:$0xff]  }
 0x431   :  { %4332 = vmatpush1.bf16.msra.mxu0 %v6187_v8  ;;  %v6288_v8 = vld [vmem:[#allocation4 + $0xe2c] ss:$16 sps:$4 sm:$0xff]  }
 0x432   :  { %4333 = vmatprep.subr.bf16.mxu0 %v6195_v51  ;;  %v6324_v51 = vld [vmem:[#allocation7 + $0x58] sm:$0xff]  }
 0x435   :  { %4334 = vmatpush1.bf16.msra.mxu0 %v6193_v52  ;;  %v6286_v52 = vld [vmem:[#allocation4 + $0xe28] ss:$16 sps:$4 sm:$0xff]  }
 0x436   :  { %4335 = vmatprep.subr.bf16.mxu0 %v6201_v39  ;;  %v6325_v39 = vld [vmem:[#allocation7 + $0x18] sm:$0xff]  }
 0x439   :  { %4336 = vmatpush1.bf16.msra.mxu0 %v6199_v53  ;;  %v6291_v53 = vld [vmem:[#allocation4 + $0xe0c] ss:$16 sps:$4 sm:$0xff]  }
 0x43a   :  { %4337 = vmatprep.subr.bf16.mxu0 %v6207_v43  ;;  %v6326_v43 = vld [vmem:[#allocation7 + $0x50] sm:$0xff]  }
 0x43d   :  { %4338 = vmatpush1.bf16.msra.mxu0 %v6205_v11  ;;  %v6289_v11 = vld [vmem:[#allocation4 + $0xe08] ss:$16 sps:$4 sm:$0xff]  }
 0x43e   :  { %4339 = vmatprep.subr.bf16.mxu0 %v6213_v50  ;;  %v6327_v50 = vld [vmem:[#allocation7 + $0x10] sm:$0xff]  }
 0x441   :  { %4340 = vmatpush1.bf16.msra.mxu0 %v6211_v32  ;;  %v6294_v32 = vld [vmem:[#allocation4 + $0xfec] ss:$16 sps:$4 sm:$0xff]  }
 0x442   :  { %4341 = vmatprep.subr.bf16.mxu0 %v6219_v55  ;;  %v6292_v55 = vld [vmem:[#allocation4 + $0xfe8] ss:$16 sps:$4 sm:$0xff]  }
 0x445   :  { %4342 = vmatpush1.bf16.msra.mxu0 %v6217_v56  ;;  %v6297_v56 = vld [vmem:[#allocation4 + $0xfcc] ss:$16 sps:$4 sm:$0xff]  }
 0x446   :  { %4343 = vmatprep.subr.bf16.mxu0 %v6225_v57  ;;  %v6295_v57 = vld [vmem:[#allocation4 + $0xfc8] ss:$16 sps:$4 sm:$0xff]  }
 0x449   :  { %4344 = vmatpush2.bf16.msra.mxu0 %v6223_v58  ;;  %v6300_v58 = vld [vmem:[#allocation4 + $0xfac] ss:$16 sps:$4 sm:$0xff]  }
 0x44a   :  { %4345 = vmatprep.subr.bf16.mxu0 %v6231_v59  ;;  %v6298_v59 = vld [vmem:[#allocation4 + $0xfa8] ss:$16 sps:$4 sm:$0xff]  }
 0x44d   :  { %4346 = vmatpush2.bf16.msra.mxu0 %v6229_v60  ;;  %v6303_v60 = vld [vmem:[#allocation4 + $0xf8c] ss:$16 sps:$4 sm:$0xff]  }
 0x44e   :  { %4347 = vmatprep.subr.bf16.mxu0 %v6237_v61  ;;  %v6301_v61 = vld [vmem:[#allocation4 + $0xf88] ss:$16 sps:$4 sm:$0xff]  }
 0x451   :  { %4348 = vmatpush2.bf16.msra.mxu0 %v6235_v54  ;;  %v6306_v54 = vld [vmem:[#allocation4 + $0xf6c] ss:$16 sps:$4 sm:$0xff]  }
 0x452   :  { %4349 = vmatprep.subr.bf16.mxu0 %v6243_v62  ;;  %v6304_v62 = vld [vmem:[#allocation4 + $0xf68] ss:$16 sps:$4 sm:$0xff]  }
 0x455   :  { %4350 = vmatpush2.bf16.msra.mxu0 %v6241_v63  ;;  %v6309_v63 = vld [vmem:[#allocation4 + $0xf4c] ss:$16 sps:$4 sm:$0xff]  }
 0x456   :  { %4351 = vmatprep.subr.bf16.mxu0 %v6249_v0  ;;  %v6307_v0 = vld [vmem:[#allocation4 + $0xf48] ss:$16 sps:$4 sm:$0xff]  }
 0x459   :  { %4352 = vmatpush2.bf16.msra.mxu0 %v6247_v1  ;;  %v6312_v1 = vld [vmem:[#allocation4 + $0xf2c] ss:$16 sps:$4 sm:$0xff]  }
 0x45a   :  { %4353 = vmatprep.subr.bf16.mxu0 %v6255_v2  ;;  %v6310_v2 = vld [vmem:[#allocation4 + $0xf28] ss:$16 sps:$4 sm:$0xff]  }
 0x45d   :  { %4354 = vmatpush2.bf16.msra.mxu0 %v6253_v3  ;;  %v6313_v3 = vld [vmem:[#allocation4 + $0xf08] ss:$16 sps:$4 sm:$0xff]  }
 0x45e   :  { %v3445_v13 = vpop.f32.mrf.mxu1  ;;  %4355 = vmatprep.subr.bf16.mxu0 %v6261_v10  ;;  %v6328_v10 = vld [vmem:[#allocation7 + $0x48] sm:$0xff]  }
 0x45f   :  { %v3446_v16 = vadd.f32 %v3445_v13, %v3405_v9  ;;  %v6330_v9 = vld [vmem:[#allocation7 + $0x40] sm:$0xff]   ;;  %v6332_v13 = vld [vmem:[#allocation7 + $0xf8] sm:$0xff]  }
 0x460   :  { %v3447_v17 = vpop.f32.mrf.mxu1 }
 0x461   :  { %v3448_v19 = vadd.f32 %v3447_v17, %v3407_v15  ;;  %4356 = vmatpush2.bf16.msra.mxu0 %v6259_v12  ;;  %v3454_v21 = vmax.f32 %v3446_v16, 0.0  ;;  %v6331_v12 = vld [vmem:[#allocation7] sm:$0xff]   ;;  %v6334_v15 = vld [vmem:[#allocation7 + $0xf0] sm:$0xff]   ;;  %v6336_v17 = vld [vmem:[#allocation7 + $0xe8] sm:$0xff]  }
 0x462   :  { %v3449_v23 = vpop.f32.mrf.mxu1  ;;  %4357 = vmatprep.subr.bf16.mxu0 %v6267_v14  ;;  %v6333_v14 = vld [vmem:[#allocation7 + $0xb8] sm:$0xff]   ;;  %v6335_v16 = vld [vmem:[#allocation7 + $0xb0] sm:$0xff]  }
 0x463   :  { %v3455_v25 = vmax.f32 %v3448_v19, 0.0  ;;  %v6624_v28 = vpack.c.bf16 %v3454_v21, %v3454_v21  ;;  %v6337_v19 = vld [vmem:[#allocation7 + $0xa8] sm:$0xff]   ;;  %v6339_v21 = vld [vmem:[#allocation7 + $0xa0] sm:$0xff]   ;;  %v6340_v23 = vld [vmem:[#allocation7 + $0xd8] sm:$0xff]  }
 0x464   :  { %v3450_v26 = vpop.f32.mrf.mxu1 }
 0x465   :  { %v3459_v24 = vpack.c.bf16 %v3455_v25, %v3455_v25  ;;  %4358 = vmatpush2.bf16.msra.mxu0 %v6265_v20  ;;  %v6338_v20 = vld [vmem:[#allocation7 + $0xe0] sm:$0xff]   ;;  %v6341_v25 = vld [vmem:[#allocation7 + $0x98] sm:$0xff]   ;;  %v6342_v26 = vld [vmem:[#allocation7 + $0xd0] sm:$0xff]  }
 0x466   :  { %5397 = vmatprep.subr.bf16.mxu0 %v6316_v38 }
 0x467   :  { %4318 = vmatprep.mubr.bf16.mxu1 %v3459_v24 }
 0x468   :  { %4319 = vmatmul.mubr.bf16.vlgmr.msra.gmra.mxu1 %v6624_v28  ;;  %4360 = vmatmul.mubr.bf16.vlgmr.msra.gmra.mxu0 %v6615_v47  ;;  %v6285_v47 = vld [vmem:[#allocation4 + $0xe4c] ss:$16 sps:$4 sm:$0xff]  }
 0x469   :  { %4369 = vmatpush1.bf16.msra.mxu1 %v6268_v27  ;;  %4400 = vmatprep.mubr.bf16.mxu1 %v3459_v24  ;;  %v6343_v24 = vld [vmem:[#allocation7 + $0x90] sm:$0xff]  }
 0x46a   :  { %4370 = vmatprep.subr.bf16.mxu1 %v6273_v29  ;;  %5398 = vmatpush3.bf16.msra.mxu0 %v6317_v40  ;;  %v6345_v29 = vld [vmem:[#allocation7 + $0x88] sm:$0xff]   ;;  %v3591_v40 = vsub.s32 4, %v6529_v6 }
 0x46b   :  { %5399 = vmatprep.subr.bf16.mxu0 %v6318_v41  ;;  %v6358_v41 = vld [vmem:[#allocation6] sm:$0x1f] }
 0x46d   :  { %4371 = vmatpush1.bf16.msra.mxu1 %v6271_v30 }
 0x46e   :  { %4372 = vmatprep.subr.bf16.mxu1 %v6276_v31  ;;  %5400 = vmatpush3.bf16.msra.mxu0 %v6319_v42  ;;  %v6359_v42 = vld [vmem:[#allocation6 + $0x8] sm:$0x1f] }
 0x46f   :  { %5401 = vmatprep.subr.bf16.mxu0 %v6320_v45 }
 0x471   :  { %4373 = vmatpush1.bf16.msra.mxu1 %v6274_v33  ;;  %v6346_v33 = vld [vmem:[#allocation7 + $0xc0] sm:$0xff]  }
 0x472   :  { %4374 = vmatprep.subr.bf16.mxu1 %v6279_v36  ;;  %5402 = vmatpush3.bf16.msra.mxu0 %v6321_v46  ;;  %v6347_v36 = vld [vmem:[#allocation7 + $0x80] sm:$0xff]  }
 0x473   :  { %5403 = vmatprep.subr.bf16.mxu0 %v6322_v37 }
 0x475   :  { %4375 = vmatpush1.bf16.msra.mxu1 %v6277_v34  ;;  %v3592_v34 = vrot.slane %v6358_v41, %v3591_v40 }
 0x476   :  { %4376 = vmatprep.subr.bf16.mxu1 %v6282_v44  ;;  %5404 = vmatpush3.bf16.msra.mxu0 %v6323_v49  ;;  %v3596_v44 = vrot.slane %v6359_v42, %v3591_v40 }
 0x477   :  { %5405 = vmatprep.subr.bf16.mxu0 %v6324_v51 }
 0x479   :  { %4377 = vmatpush1.bf16.msra.mxu1 %v6280_v35 }
 0x47a   :  { %4378 = vmatprep.subr.bf16.mxu1 %v6285_v47  ;;  %5406 = vmatpush3.bf16.msra.mxu0 %v6325_v39 }
 0x47b   :  { %5407 = vmatprep.subr.bf16.mxu0 %v6326_v43 }
 0x47d   :  { %4379 = vmatpush1.bf16.msra.mxu1 %v6283_v48 }
 0x47e   :  { %4380 = vmatprep.subr.bf16.mxu1 %v6288_v8  ;;  %5408 = vmatpush3.bf16.msra.mxu0 %v6327_v50 }
 0x47f   :  { %5409 = vmatprep.subr.bf16.mxu0 %v6328_v10 }
 0x481   :  { %4381 = vmatpush1.bf16.msra.mxu1 %v6286_v52 }
 0x482   :  { %4382 = vmatprep.subr.bf16.mxu1 %v6291_v53  ;;  %5410 = vmatpush3.bf16.msra.mxu0 %v6329_v4 }
 0x483   :  { %5411 = vmatprep.subr.bf16.mxu0 %v6330_v9 }
 0x485   :  { %4383 = vmatpush1.bf16.msra.mxu1 %v6289_v11 }
 0x486   :  { %4384 = vmatprep.subr.bf16.mxu1 %v6294_v32  ;;  %5412 = vmatpush3.bf16.msra.mxu0 %v6331_v12  ;;  %v3600_v32 = vrot.slane %v6589_v18, %v3591_v40  ;;  %v4761_v12 = vand.u32 127, %v157_v5 }
 0x488   :  { %vm4762_vm0 = vcmp.lt.s32.totalorder %v4761_v12, 64  ;;  %vm4774_vm1 = vcmp.eq.s32.totalorder %v4761_v12, 64 }
 0x489   :  { %4385 = vmatpush2.bf16.msra.mxu1 %v6292_v55  ;;  %v3604_v55 = vrot.slane %v6593_v22, %v3591_v40  ;;  %v5364_v22 = vld [vmem:[#allocation9] ss:$0 sm:$0xff] }
 0x48a   :  { %4386 = vmatprep.subr.bf16.mxu1 %v6297_v56 }
 0x48d   :  { %4387 = vmatpush2.bf16.msra.mxu1 %v6295_v57 }
 0x48e   :  { %4388 = vmatprep.subr.bf16.mxu1 %v6300_v58 }
 0x491   :  { %4389 = vmatpush2.bf16.msra.mxu1 %v6298_v59 }
 0x492   :  { %4390 = vmatprep.subr.bf16.mxu1 %v6303_v60 }
 0x495   :  { %4391 = vmatpush2.bf16.msra.mxu1 %v6301_v61 }
 0x496   :  { %4392 = vmatprep.subr.bf16.mxu1 %v6306_v54 }
 0x499   :  { %4393 = vmatpush2.bf16.msra.mxu1 %v6304_v62 }
 0x49a   :  { %4394 = vmatprep.subr.bf16.mxu1 %v6309_v63 }
 0x49d   :  { %4395 = vmatpush2.bf16.msra.mxu1 %v6307_v0 }
 0x49e   :  { %4396 = vmatprep.subr.bf16.mxu1 %v6312_v1 }
 0x4a1   :  { %4397 = vmatpush2.bf16.msra.mxu1 %v6310_v2 }
 0x4a2   :  { %4398 = vmatprep.subr.bf16.mxu1 %v6315_v7 }
 0x4a5   :  { %4399 = vmatpush2.bf16.msra.mxu1 %v6313_v3 }
 0x4a6   :  { %5419 = vmatprep.subr.bf16.mxu1 %v6332_v13 }
 0x4a8   :  { %4401 = vmatmul.mubr.bf16.vlgmr.msra.gmra.mxu1 %v6624_v28  ;;  %v6344_v28 = vld [vmem:[#allocation7 + $0xc8] sm:$0xff]  }
 0x4a9   :  { %5420 = vmatpush3.bf16.msra.mxu1 %v6333_v14 }
 0x4aa   :  { %5421 = vmatprep.subr.bf16.mxu1 %v6334_v15 }
 0x4ad   :  { %5422 = vmatpush3.bf16.msra.mxu1 %v6335_v16 }
 0x4ae   :  { %5423 = vmatprep.subr.bf16.mxu1 %v6336_v17 }
 0x4b1   :  { %5424 = vmatpush3.bf16.msra.mxu1 %v6337_v19 }
 0x4b2   :  { %5425 = vmatprep.subr.bf16.mxu1 %v6338_v20 }
 0x4b5   :  { %5426 = vmatpush3.bf16.msra.mxu1 %v6339_v21 }
 0x4b6   :  { %5427 = vmatprep.subr.bf16.mxu1 %v6340_v23 }
 0x4b9   :  { %5428 = vmatpush3.bf16.msra.mxu1 %v6341_v25 }
 0x4ba   :  { %5429 = vmatprep.subr.bf16.mxu1 %v6342_v26 }
 0x4bd   :  { %5430 = vmatpush3.bf16.msra.mxu1 %v6343_v24 }
 0x4be   :  { %5431 = vmatprep.subr.bf16.mxu1 %v6344_v28 }
 0x4c1   :  { %5432 = vmatpush3.bf16.msra.mxu1 %v6345_v29 }
 0x4c2   :  { %5433 = vmatprep.subr.bf16.mxu1 %v6346_v33 }
 0x4c5   :  { %5434 = vmatpush3.bf16.msra.mxu1 %v6347_v36 }
 0x4e8   :  { %v4279_v27 = vpop.f32.mrf.mxu0 }
 0x4e9   :  { %v4280_v45 = vadd.f32 %v4279_v27, %v3592_v34 }
 0x4ea   :  { %v4281_v30 = vpop.f32.mrf.mxu0 }
 0x4eb   :  { %v4282_v47 = vadd.f32 %v4281_v30, %v3596_v44 }
 0x4ec   :  { %v4283_v31 = vpop.f32.mrf.mxu0 }
 0x4ee   :  { %v4284_v38 = vpop.f32.mrf.mxu0 }
 0x528   :  { %v4320_v35 = vpop.f32.mrf.mxu1  ;;  %v4361_v46 = vpop.f32.mrf.mxu0 }
 0x529   :  { %v4321_v37 = vadd.f32 %v4320_v35, %v4280_v45  ;;  %v4362_v56 = vadd.f32 %v4361_v46, %v3600_v32 }
 0x52a   :  { %v4322_v48 = vpop.f32.mrf.mxu1  ;;  %v4363_v49 = vpop.f32.mrf.mxu0 }
 0x52b   :  { %v4323_v8 = vadd.f32 %v4322_v48, %v4282_v47  ;;  %v4409_v51 = vmax.f32 %v4321_v37, 0.0  ;;  %v4364_v58 = vadd.f32 %v4363_v49, %v3604_v55 }
 0x52c   :  { %v4324_v52 = vpop.f32.mrf.mxu1  ;;  %v4365_v39 = vpop.f32.mrf.mxu0 }
 0x52d   :  { %v4410_v53 = vmax.f32 %v4323_v8, 0.0  ;;  %v4413_v6 = vpack.c.bf16 %v4409_v51, %v4409_v51 }
 0x52e   :  { %v4325_v43 = vpop.f32.mrf.mxu1  ;;  %v4366_v11 = vpop.f32.mrf.mxu0 }
 0x52f   :  { %v4414_v50 = vpack.c.bf16 %v4410_v53, %v4410_v53 }
 0x531   :  { %4712 = vmatprep.mubr.bf16.mxu0 %v4414_v50 }
 0x532   :  { %4713 = vmatmul.mubr.bf16.vlgmr.msra.gmra.mxu0 %v4413_v6 }
 0x568   :  { %v4402_v57 = vpop.f32.mrf.mxu1 }
 0x569   :  { %v4403_v59 = vadd.f32 %v4402_v57, %v4362_v56 }
 0x56a   :  { %v4404_v60 = vpop.f32.mrf.mxu1 }
 0x56b   :  { %v4405_v61 = vadd.f32 %v4404_v60, %v4364_v58  ;;  %v4411_v54 = vmax.f32 %v4403_v59, 0.0 }
 0x56c   :  { %v4406_v62 = vpop.f32.mrf.mxu1 }
 0x56d   :  { %v4412_v63 = vmax.f32 %v4405_v61, 0.0  ;;  %v4415_v2 = vpack.c.bf16 %v4411_v54, %v4411_v54 }
 0x56e   :  { %v4407_v0 = vpop.f32.mrf.mxu1 }
 0x56f   :  { %v4416_v1 = vpack.c.bf16 %v4412_v63, %v4412_v63 }
 0x571   :  { %4752 = vmatprep.mubr.bf16.mxu1 %v4416_v1 }
 0x572   :  { %4753 = vmatmul.mubr.bf16.vlgmr.msra.gmra.mxu1 %v4415_v2 }
 0x5f2   :  { %v5413_v7 = vpop.f32.mrf.mxu0 }
 0x5f4   :  { %v5414_v3 = vpop.f32.mrf.mxu0 }
 0x5f5   :  { %v5415_v4 = vadd.f32 %v5414_v3, %v5413_v7 }
 0x5f6   :  { %v5416_v10 = vpop.f32.mrf.mxu0 }
 0x5f7   :  { %v4715_v14 = vadd.f32 %v5415_v4, %v5364_v22 }
 0x5f8   :  { %v5417_v18 = vpop.f32.mrf.mxu0 }
 0x632   :  { %v5435_v9 = vpop.f32.mrf.mxu1 }
 0x634   :  { %v5436_v13 = vpop.f32.mrf.mxu1 }
 0x635   :  { %v5437_v15 = vadd.f32 %v5436_v13, %v5435_v9 }
 0x636   :  { %v5438_v16 = vpop.f32.mrf.mxu1 }
 0x637   :  { %v4755_v17 = vadd.f32 %v5437_v15, %v4715_v14 }
 0x638   :  { %v5439_v19 = vpop.f32.mrf.mxu1 }
 0x639   :  { %v4763_v20 = vsel %vm4762_vm0, %v4755_v17, -1e+30 }
 0x63a   :  { %4764 = vmax.xlane.f32.xlu0 %v4763_v20 }
 0x6c3   :  { %v4765_v21 = vpop.xlane.xlu0 %4764 }
 0x6c4   :  { %v4766_v23 = vsub.f32 %v4755_v17, %v4765_v21 }
 0x6c6   :  { %v4767_v25 = vmul.f32 1.442695, %v4766_v23 }
 0x6c8   :  { %6348 = vpow2.f32 %v4767_v25 }
 0x6c9   :  { %6350 = vtanh.f32 %v4755_v17 }
 0x6d5   :  { %v6349_v26 = vpop.eup %6348 }
 0x6d6   :  { %v4769_v24 = vsel %vm4762_vm0, %v6349_v26, 0.0  ;;  %v6351_v5 = vpop.eup %6350 }
 0x6d7   :  { %4770 = vadd.xlane.f32.xlu0 %v4769_v24  ;;  %v4776_v30 = vsel %vm4774_vm1, %v6351_v5, 0.0 }
 0x760   :  { %v4771_v27 = vpop.xlane.xlu0 %4770 }
 0x761   :  { %6352 = vrcp.f32 %v4771_v27 }
 0x76e   :  { %v6353_v28 = vpop.eup %6352 }
 0x76f   :  { %v4773_v29 = vmul.f32 %v6353_v28, %v4769_v24 }
 0x771   :  { %v4777_v31 = vadd.f32 %v4776_v30, %v4773_v29 }
 0x773   :  { %4778 = vst [vmem:[%s6642_s6] sm:$0xff] %v4777_v31 }
 0x774   :  { %4783 = vsyncpa [#allocation3], 1 }
 0x775   :  { %4784 = vsyncpa [#allocation5], 1 }
 0x776   :  { %4785 = vsyncpa [#allocation8], 1 }

</bundles_post_ra>
